<compile_context>
chip_gen: v5e
topology: v5e:2x2
jax: 0.10.0
libtpu: 0.0.40
codegen_flags: <defaults>
</compile_context>

<pallas_src>
import functools

import jax
import jax.numpy as jnp
from jax import lax
from jax.experimental import pallas as pl
from jax.experimental.pallas import tpu as pltpu

STYLE_DIM = 512
EPS = 1e-5          # adaIN eps (added to std, like the PyTorch code)
NEG_SLOPE = 0.01    # nn.LeakyReLU default


def _leaky_relu(v):
    return jnp.where(v >= 0, v, NEG_SLOPE * v)


def _round_up(n, m):
    return (n + m - 1) // m * m


def _style_resblock_kernel(x_ref, style_ref, col_ref,
                           w3_ref, w1_ref, w2_ref, o_ref,
                           *, H, W, Cin_p, Cout_p, Cmax_p, Cout):
    HW = H * W
    x = x_ref[0]                                   # (Cin_p, HW) f32

    # ---- boundary masks, built in-kernel (shared by both convs) -----------
    # Row validity only needs the flat lane index (no div/mod):
    #   h >= 1    <=>  p >= W        ;  h <= H-2  <=>  p < HW - W
    lane = lax.broadcasted_iota(jnp.int32, (1, HW), 1)
    col = col_ref[...]                             # (1, HW) f32 column index w
    row_mask = {-1: (lane >= W).astype(jnp.float32),
                1: (lane < HW - W).astype(jnp.float32)}
    col_mask = {-1: (col >= 1.0).astype(jnp.float32),
                1: (col <= float(W - 2)).astype(jnp.float32)}

    def tap_mask(dh, dw):
        rm = row_mask.get(dh)
        cm = col_mask.get(dw)
        if rm is None and cm is None:
            return None
        if rm is None:
            return cm
        if cm is None:
            return rm
        return rm * cm

    masks9 = [tap_mask(dh, dw) for dh in (-1, 0, 1) for dw in (-1, 0, 1)]

    # ---- packed per-batch style vectors (channels on sublanes) ------------
    style = style_ref[0]                           # (4*Cmax_p, 1) f32
    mean1 = style[0:Cin_p]
    std1 = style[Cmax_p:Cmax_p + Cin_p]
    mean2 = style[2 * Cmax_p:2 * Cmax_p + Cout_p]
    std2 = style[3 * Cmax_p:3 * Cmax_p + Cout_p]

    inv_hw = 1.0 / HW
    inv_hwm1 = 1.0 / max(HW - 1, 1)                # unbiased std (torch.std)

    def adain_lrelu(feat, mean_s, std_s):
        # Two-pass instance stats over the spatial (lane) axis; the
        # (feat - mean) term is reused for the normalization itself.
        mu = jnp.sum(feat, axis=1, keepdims=True) * inv_hw        # (C, 1)
        d = feat - mu
        var = jnp.sum(d * d, axis=1, keepdims=True) * inv_hwm1    # (C, 1)
        sd = jnp.sqrt(var) + EPS
        v = d * (std_s / sd) + mean_s              # only C-sized divides
        return _leaky_relu(v)

    def conv3x3(feat, w_ref):
        # 3x3 "same" conv as 9 accumulating MXU matmuls; only one rolled
        # (C_p, HW) tap temporary is live at any time.
        acc = None
        t = 0
        for dh in (-1, 0, 1):
            for dw in (-1, 0, 1):
                off = dh * W + dw
                if dh == 0 and dw == 0:
                    tap = feat
                else:
                    tap = pltpu.roll(feat, (-off) % HW, axis=1)
                    tap = tap * masks9[t]
                contrib = jnp.dot(w_ref[t], tap.astype(jnp.bfloat16),
                                  preferred_element_type=jnp.float32)
                acc = contrib if acc is None else acc + contrib
                t += 1
        return acc                                 # (Cout_p, HW) f32

    out = adain_lrelu(x, mean1, std1)
    out = conv3x3(out, w1_ref)
    out = adain_lrelu(out, mean2, std2)
    out = conv3x3(out, w2_ref)

    # Residual path (1x1 conv) deferred to the end: x_ref is still resident,
    # so this adds no VMEM pressure during the heavy conv/adaIN phase.
    res = jnp.dot(w3_ref[...], x_ref[0].astype(jnp.bfloat16),
                  preferred_element_type=jnp.float32)              # (Cout_p, HW)

    o_ref[0] = (out + res)[:Cout].astype(o_ref.dtype)              # lane-dense vst


def style_resblock(x_nchw, y, p):
    """x_nchw: (B, Cin, H, W) float32; y: (B, 512) float32."""
    B, Cin, H, W = x_nchw.shape
    Cout = p["conv3_w"].shape[0]
    HW = H * W
    # Pad channels to a multiple of 16 (bf16 sublane packing).
    Cin_p = _round_up(Cin, 16)
    Cout_p = _round_up(Cout, 16)
    Cmax_p = max(Cin_p, Cout_p)

    # --- activations: NCHW with spatial flattened onto lanes (no transpose) -
    x_flat = x_nchw.reshape(B, Cin, HW).astype(jnp.float32)
    x_flat = jnp.pad(x_flat, ((0, 0), (0, Cin_p - Cin), (0, 0)))

    # --- style projections hoisted out of the kernel, packed into 1 buffer --
    y = y.astype(jnp.float32)

    def proj(wk, bk):
        v = y @ p[wk].T + p[bk]                                    # (B, C)
        return jnp.pad(v, ((0, 0), (0, Cmax_p - v.shape[1])))      # (B, Cmax_p)

    style = jnp.concatenate(
        [proj("mean1_w", "mean1_b"), proj("std1_w", "std1_b"),
         proj("mean2_w", "mean2_b"), proj("std2_w", "std2_b")],
        axis=1).reshape(B, 4 * Cmax_p, 1)                          # (B, 4*Cmax_p, 1)

    # --- conv weights: bf16, per-tap layout (9, Cout_p, C_p) ----------------
    w3 = jnp.pad(p["conv3_w"].reshape(Cout, Cin),
                 ((0, Cout_p - Cout), (0, Cin_p - Cin))).astype(jnp.bfloat16)

    def per_tap(w, c_in, c_in_pad):
        c_out = w.shape[0]
        wt = jnp.transpose(w, (2, 3, 0, 1)).reshape(9, c_out, c_in)
        wt = jnp.pad(wt, ((0, 0), (0, Cout_p - c_out), (0, c_in_pad - c_in)))
        return wt.astype(jnp.bfloat16)                             # (9, Cout_p, C_p)

    w1 = per_tap(p["conv1_w"], Cin, Cin_p)
    w2 = per_tap(p["conv2_w"], Cout, Cout_p)

    # --- single (1, HW) column-index vector (row masks are in-kernel iota) --
    col = (jnp.arange(HW, dtype=jnp.int32) % W).astype(jnp.float32).reshape(1, HW)

    kernel = functools.partial(_style_resblock_kernel, H=H, W=W,
                               Cin_p=Cin_p, Cout_p=Cout_p,
                               Cmax_p=Cmax_p, Cout=Cout)

    out_flat = pl.pallas_call(
        kernel,
        out_shape=jax.ShapeDtypeStruct((B, Cout, HW), jnp.float32),
        grid=(B,),
        in_specs=[
            pl.BlockSpec((1, Cin_p, HW), lambda b: (b, 0, 0)),        # x
            pl.BlockSpec((1, 4 * Cmax_p, 1), lambda b: (b, 0, 0)),    # packed style
            pl.BlockSpec((1, HW), lambda b: (0, 0)),                  # col index
            pl.BlockSpec((Cout_p, Cin_p), lambda b: (0, 0)),          # w3 (1x1)
            pl.BlockSpec((9, Cout_p, Cin_p), lambda b: (0, 0, 0)),    # w1 taps
            pl.BlockSpec((9, Cout_p, Cout_p), lambda b: (0, 0, 0)),   # w2 taps
        ],
        out_specs=pl.BlockSpec((1, Cout, HW), lambda b: (b, 0, 0)),
        compiler_params=pltpu.CompilerParams(
            dimension_semantics=("parallel",),
            vmem_limit_bytes=64 * 1024 * 1024),
    )(x_flat, style, col, w3, w1, w2)

    return out_flat.reshape(B, Cout, H, W)


# ----------------------- parameter init (deterministic) ---------------------
def _spectral_normalize(w, n_iter=30):
    # spectral_norm is a weight re-parameterization; apply once at init time
    # in plain JAX (PyTorch convention: flatten weight to (out, -1)).
    w2d = w.reshape(w.shape[0], -1)
    v = jnp.ones((w2d.shape[1],), jnp.float32) / jnp.sqrt(w2d.shape[1])
    u = jnp.ones((w2d.shape[0],), jnp.float32) / jnp.sqrt(w2d.shape[0])
    for _ in range(n_iter):
        u = w2d @ v
        u = u / (jnp.linalg.norm(u) + 1e-12)
        v = w2d.T @ u
        v = v / (jnp.linalg.norm(v) + 1e-12)
    sigma = u @ (w2d @ v)
    return w / sigma


def init_params(key, in_channel, out_channel):
    ks = jax.random.split(key, 12)
    n = lambda k, shape: 0.1 * jax.random.normal(k, shape, jnp.float32)
    sn = _spectral_normalize
    return {
        "conv1_w": sn(n(ks[0], (out_channel, in_channel, 3, 3))),
        "conv2_w": sn(n(ks[1], (out_channel, out_channel, 3, 3))),
        "conv3_w": sn(n(ks[2], (out_channel, in_channel, 1, 1))),
        "mean1_w": sn(n(ks[3], (in_channel, STYLE_DIM))),
        "mean1_b": n(ks[4], (in_channel,)),
        "std1_w": sn(n(ks[5], (in_channel, STYLE_DIM))),
        "std1_b": n(ks[6], (in_channel,)),
        "mean2_w": sn(n(ks[7], (out_channel, STYLE_DIM))),
        "mean2_b": n(ks[8], (out_channel,)),
        "std2_w": sn(n(ks[9], (out_channel, STYLE_DIM))),
        "std2_b": n(ks[10], (out_channel,)),
    }


# ----------------------- pure-JAX reference (for checking) ------------------
def reference(x, y, p):
    def conv(xi, w, pad):
        return lax.conv_general_dilated(
            xi, w, (1, 1), ((pad, pad), (pad, pad)),
            dimension_numbers=("NCHW", "OIHW", "NCHW"))

    def adain(f, m, s):
        B, C, H, W = f.shape
        ff = f.reshape(B, C, -1)
        sd = jnp.std(ff, axis=2, ddof=1).reshape(B, C, 1) + EPS
        mu = jnp.mean(ff, axis=2).reshape(B, C, 1)
        return (s[:, :, None] * (ff - mu) / sd + m[:, :, None]).reshape(B, C, H, W)

    res = conv(x, p["conv3_w"], 0)
    mean1 = y @ p["mean1_w"].T + p["mean1_b"]
    std1 = y @ p["std1_w"].T + p["std1_b"]
    out = _leaky_relu(adain(x, mean1, std1))
    out = conv(out, p["conv1_w"], 1)
    mean2 = y @ p["mean2_w"].T + p["mean2_b"]
    std2 = y @ p["std2_w"].T + p["std2_b"]
    out = _leaky_relu(adain(out, mean2, std2))
    out = conv(out, p["conv2_w"], 1)
    return out + res


if __name__ == "__main__":
    key = jax.random.PRNGKey(0)
    kx, ky, kp = jax.random.split(key, 3)

    B, Cin, Cout, H, W = 2, 4, 8, 16, 16
    x = jax.random.normal(kx, (B, Cin, H, W), jnp.float32)
    y = jax.random.normal(ky, (B, STYLE_DIM), jnp.float32)
    params = init_params(kp, Cin, Cout)

    out = style_resblock(x, y, params)
    out = jax.block_until_ready(out)
    assert out.shape == (B, Cout, H, W)

    ref = reference(x, y, params)
    # Note: activations are cast to bf16 at the MXU boundary (both convs and
    # the residual), giving ~1e-2 relative error vs the f32 reference.
    err = float(jnp.max(jnp.abs(out - ref)))
    scale = float(jnp.max(jnp.abs(ref))) + 1e-6
    assert err / scale < 5e-2, f"kernel/reference mismatch: max_err={err}, scale={scale}"

    print("KERNEL_OK")
</pallas_src>

<mosaic_0001>
module attributes {stable_mosaic.version = 11 : i64} {
  func.func @_style_resblock_kernel(%arg0: i32, %arg1: memref<1x16x256xf32, #tpu.memory_space<vmem>>, %arg2: memref<1x64x1xf32, #tpu.memory_space<vmem>>, %arg3: memref<1x256xf32, #tpu.memory_space<vmem>>, %arg4: memref<16x16xbf16, #tpu.memory_space<vmem>>, %arg5: memref<9x16x16xbf16, #tpu.memory_space<vmem>>, %arg6: memref<9x16x16xbf16, #tpu.memory_space<vmem>>, %arg7: memref<1x8x256xf32, #tpu.memory_space<vmem>>) attributes {dimension_semantics = [#tpu.dimension_semantics<parallel>], iteration_bounds = array<i64: 2>, scalar_prefetch = 0 : i64, scratch_operands = 0 : i64, tpu.core_type = #tpu.core_type<tc>, window_params = [{transform_indices = @transform_0, window_bounds = array<i64: 1, 16, 256>}, {transform_indices = @transform_1, window_bounds = array<i64: 1, 64, 1>}, {pipeline_mode = #tpu.pipeline_mode<synchronous>, transform_indices = @transform_2, window_bounds = array<i64: 1, 256>}, {pipeline_mode = #tpu.pipeline_mode<synchronous>, transform_indices = @transform_3, window_bounds = array<i64: 16, 16>}, {pipeline_mode = #tpu.pipeline_mode<synchronous>, transform_indices = @transform_4, window_bounds = array<i64: 9, 16, 16>}, {pipeline_mode = #tpu.pipeline_mode<synchronous>, transform_indices = @transform_5, window_bounds = array<i64: 9, 16, 16>}, {transform_indices = @transform_6, window_bounds = array<i64: 1, 8, 256>}]} {
    %c0 = arith.constant 0 : index
    %c0_0 = arith.constant 0 : index
    %c0_1 = arith.constant 0 : index
    %0 = vector.load %arg1[%c0, %c0_0, %c0_1] : memref<1x16x256xf32, #tpu.memory_space<vmem>>, vector<1x16x256xf32>
    %1 = vector.shape_cast %0 : vector<1x16x256xf32> to vector<16x256xf32>
    %2 = tpu.iota {dimensions = array<i32: 1>} : vector<1x256xi32>
    %c0_2 = arith.constant 0 : index
    %c0_3 = arith.constant 0 : index
    %3 = vector.load %arg3[%c0_2, %c0_3] : memref<1x256xf32, #tpu.memory_space<vmem>>, vector<1x256xf32>
    %c16_i32 = arith.constant 16 : i32
    %4 = vector.broadcast %c16_i32 : i32 to vector<1x256xi32>
    %5 = arith.cmpi sge, %2, %4 : vector<1x256xi32>
    %6 = arith.extui %5 : vector<1x256xi1> to vector<1x256xi32>
    %7 = arith.sitofp %6 : vector<1x256xi32> to vector<1x256xf32>
    %c240_i32 = arith.constant 240 : i32
    %8 = vector.broadcast %c240_i32 : i32 to vector<1x256xi32>
    %9 = arith.cmpi slt, %2, %8 : vector<1x256xi32>
    %10 = arith.extui %9 : vector<1x256xi1> to vector<1x256xi32>
    %11 = arith.sitofp %10 : vector<1x256xi32> to vector<1x256xf32>
    %cst = arith.constant 1.000000e+00 : f32
    %12 = vector.broadcast %cst : f32 to vector<1x256xf32>
    %13 = arith.cmpf oge, %3, %12 : vector<1x256xf32>
    %14 = arith.extui %13 : vector<1x256xi1> to vector<1x256xi32>
    %15 = arith.sitofp %14 : vector<1x256xi32> to vector<1x256xf32>
    %cst_4 = arith.constant 1.400000e+01 : f32
    %16 = vector.broadcast %cst_4 : f32 to vector<1x256xf32>
    %17 = arith.cmpf ole, %3, %16 : vector<1x256xf32>
    %18 = arith.extui %17 : vector<1x256xi1> to vector<1x256xi32>
    %19 = arith.sitofp %18 : vector<1x256xi32> to vector<1x256xf32>
    %20 = arith.mulf %7, %15 : vector<1x256xf32>
    %21 = arith.mulf %7, %19 : vector<1x256xf32>
    %22 = arith.mulf %11, %15 : vector<1x256xf32>
    %23 = arith.mulf %11, %19 : vector<1x256xf32>
    %c0_5 = arith.constant 0 : index
    %c0_6 = arith.constant 0 : index
    %c0_7 = arith.constant 0 : index
    %24 = vector.load %arg2[%c0_5, %c0_6, %c0_7] : memref<1x64x1xf32, #tpu.memory_space<vmem>>, vector<1x64x1xf32>
    %25 = vector.shape_cast %24 : vector<1x64x1xf32> to vector<64x1xf32>
    %26 = vector.extract_strided_slice %25 {offsets = [0, 0], sizes = [16, 1], strides = [1, 1]} : vector<64x1xf32> to vector<16x1xf32>
    %27 = vector.extract_strided_slice %25 {offsets = [16, 0], sizes = [16, 1], strides = [1, 1]} : vector<64x1xf32> to vector<16x1xf32>
    %28 = vector.extract_strided_slice %25 {offsets = [32, 0], sizes = [16, 1], strides = [1, 1]} : vector<64x1xf32> to vector<16x1xf32>
    %29 = vector.extract_strided_slice %25 {offsets = [48, 0], sizes = [16, 1], strides = [1, 1]} : vector<64x1xf32> to vector<16x1xf32>
    %cst_8 = arith.constant dense<0.000000e+00> : vector<16xf32>
    %30 = vector.multi_reduction <add>, %1, %cst_8 [1] : vector<16x256xf32> to vector<16xf32>
    %31 = vector.shape_cast %30 : vector<16xf32> to vector<16x1xf32>
    %cst_9 = arith.constant 3.906250e-03 : f32
    %32 = vector.broadcast %cst_9 : f32 to vector<16x1xf32>
    %33 = arith.mulf %31, %32 : vector<16x1xf32>
    %34 = vector.broadcast %33 : vector<16x1xf32> to vector<16x256xf32>
    %35 = arith.subf %1, %34 : vector<16x256xf32>
    %36 = arith.mulf %35, %35 : vector<16x256xf32>
    %cst_10 = arith.constant dense<0.000000e+00> : vector<16xf32>
    %37 = vector.multi_reduction <add>, %36, %cst_10 [1] : vector<16x256xf32> to vector<16xf32>
    %38 = vector.shape_cast %37 : vector<16xf32> to vector<16x1xf32>
    %cst_11 = arith.constant 0.00392156886 : f32
    %39 = vector.broadcast %cst_11 : f32 to vector<16x1xf32>
    %40 = arith.mulf %38, %39 : vector<16x1xf32>
    %41 = math.sqrt %40 : vector<16x1xf32>
    %cst_12 = arith.constant 9.99999974E-6 : f32
    %42 = vector.broadcast %cst_12 : f32 to vector<16x1xf32>
    %43 = arith.addf %41, %42 : vector<16x1xf32>
    %44 = arith.divf %27, %43 : vector<16x1xf32>
    %45 = vector.broadcast %44 : vector<16x1xf32> to vector<16x256xf32>
    %46 = arith.mulf %35, %45 : vector<16x256xf32>
    %47 = vector.broadcast %26 : vector<16x1xf32> to vector<16x256xf32>
    %48 = arith.addf %46, %47 : vector<16x256xf32>
    %cst_13 = arith.constant 0.000000e+00 : f32
    %49 = vector.broadcast %cst_13 : f32 to vector<16x256xf32>
    %50 = arith.cmpf oge, %48, %49 : vector<16x256xf32>
    %cst_14 = arith.constant 0.00999999977 : f32
    %51 = vector.broadcast %cst_14 : f32 to vector<16x256xf32>
    %52 = arith.mulf %51, %48 : vector<16x256xf32>
    %53 = arith.select %50, %48, %52 : vector<16x256xi1>, vector<16x256xf32>
    %c17_i32 = arith.constant 17 : i32
    %54 = tpu.dynamic_rotate %53 by %c17_i32 dim 1 : vector<16x256xf32>, i32 -> vector<16x256xf32>
    %55 = vector.broadcast %20 : vector<1x256xf32> to vector<16x256xf32>
    %56 = arith.mulf %54, %55 : vector<16x256xf32>
    %c0_15 = arith.constant 0 : index
    %c0_16 = arith.constant 0 : index
    %c0_17 = arith.constant 0 : index
    %57 = vector.load %arg5[%c0_15, %c0_16, %c0_17] : memref<9x16x16xbf16, #tpu.memory_space<vmem>>, vector<1x16x16xbf16>
    %58 = vector.shape_cast %57 : vector<1x16x16xbf16> to vector<16x16xbf16>
    %59 = arith.truncf %56 : vector<16x256xf32> to vector<16x256xbf16>
    %cst_18 = arith.constant dense<0.000000e+00> : vector<16x256xf32>
    %60 = tpu.matmul %58, %59, %cst_18 {dimension_numbers = #tpu.dot_dimension_numbers<[1], [0], [0], [1], [0, 0, 1, 1], [], []>} : vector<16x16xbf16>, vector<16x256xbf16>, vector<16x256xf32> -> vector<16x256xf32>
    %c16_i32_19 = arith.constant 16 : i32
    %61 = tpu.dynamic_rotate %53 by %c16_i32_19 dim 1 : vector<16x256xf32>, i32 -> vector<16x256xf32>
    %62 = vector.broadcast %7 : vector<1x256xf32> to vector<16x256xf32>
    %63 = arith.mulf %61, %62 : vector<16x256xf32>
    %c1 = arith.constant 1 : index
    %c0_20 = arith.constant 0 : index
    %c0_21 = arith.constant 0 : index
    %64 = vector.load %arg5[%c1, %c0_20, %c0_21] : memref<9x16x16xbf16, #tpu.memory_space<vmem>>, vector<1x16x16xbf16>
    %65 = vector.shape_cast %64 : vector<1x16x16xbf16> to vector<16x16xbf16>
    %66 = arith.truncf %63 : vector<16x256xf32> to vector<16x256xbf16>
    %cst_22 = arith.constant dense<0.000000e+00> : vector<16x256xf32>
    %67 = tpu.matmul %65, %66, %cst_22 {dimension_numbers = #tpu.dot_dimension_numbers<[1], [0], [0], [1], [0, 0, 1, 1], [], []>} : vector<16x16xbf16>, vector<16x256xbf16>, vector<16x256xf32> -> vector<16x256xf32>
    %68 = arith.addf %60, %67 : vector<16x256xf32>
    %c15_i32 = arith.constant 15 : i32
    %69 = tpu.dynamic_rotate %53 by %c15_i32 dim 1 : vector<16x256xf32>, i32 -> vector<16x256xf32>
    %70 = vector.broadcast %21 : vector<1x256xf32> to vector<16x256xf32>
    %71 = arith.mulf %69, %70 : vector<16x256xf32>
    %c2 = arith.constant 2 : index
    %c0_23 = arith.constant 0 : index
    %c0_24 = arith.constant 0 : index
    %72 = vector.load %arg5[%c2, %c0_23, %c0_24] : memref<9x16x16xbf16, #tpu.memory_space<vmem>>, vector<1x16x16xbf16>
    %73 = vector.shape_cast %72 : vector<1x16x16xbf16> to vector<16x16xbf16>
    %74 = arith.truncf %71 : vector<16x256xf32> to vector<16x256xbf16>
    %cst_25 = arith.constant dense<0.000000e+00> : vector<16x256xf32>
    %75 = tpu.matmul %73, %74, %cst_25 {dimension_numbers = #tpu.dot_dimension_numbers<[1], [0], [0], [1], [0, 0, 1, 1], [], []>} : vector<16x16xbf16>, vector<16x256xbf16>, vector<16x256xf32> -> vector<16x256xf32>
    %76 = arith.addf %68, %75 : vector<16x256xf32>
    %c1_i32 = arith.constant 1 : i32
    %77 = tpu.dynamic_rotate %53 by %c1_i32 dim 1 : vector<16x256xf32>, i32 -> vector<16x256xf32>
    %78 = vector.broadcast %15 : vector<1x256xf32> to vector<16x256xf32>
    %79 = arith.mulf %77, %78 : vector<16x256xf32>
    %c3 = arith.constant 3 : index
    %c0_26 = arith.constant 0 : index
    %c0_27 = arith.constant 0 : index
    %80 = vector.load %arg5[%c3, %c0_26, %c0_27] : memref<9x16x16xbf16, #tpu.memory_space<vmem>>, vector<1x16x16xbf16>
    %81 = vector.shape_cast %80 : vector<1x16x16xbf16> to vector<16x16xbf16>
    %82 = arith.truncf %79 : vector<16x256xf32> to vector<16x256xbf16>
    %cst_28 = arith.constant dense<0.000000e+00> : vector<16x256xf32>
    %83 = tpu.matmul %81, %82, %cst_28 {dimension_numbers = #tpu.dot_dimension_numbers<[1], [0], [0], [1], [0, 0, 1, 1], [], []>} : vector<16x16xbf16>, vector<16x256xbf16>, vector<16x256xf32> -> vector<16x256xf32>
    %84 = arith.addf %76, %83 : vector<16x256xf32>
    %c4 = arith.constant 4 : index
    %c0_29 = arith.constant 0 : index
    %c0_30 = arith.constant 0 : index
    %85 = vector.load %arg5[%c4, %c0_29, %c0_30] : memref<9x16x16xbf16, #tpu.memory_space<vmem>>, vector<1x16x16xbf16>
    %86 = vector.shape_cast %85 : vector<1x16x16xbf16> to vector<16x16xbf16>
    %87 = arith.truncf %53 : vector<16x256xf32> to vector<16x256xbf16>
    %cst_31 = arith.constant dense<0.000000e+00> : vector<16x256xf32>
    %88 = tpu.matmul %86, %87, %cst_31 {dimension_numbers = #tpu.dot_dimension_numbers<[1], [0], [0], [1], [0, 0, 1, 1], [], []>} : vector<16x16xbf16>, vector<16x256xbf16>, vector<16x256xf32> -> vector<16x256xf32>
    %89 = arith.addf %84, %88 : vector<16x256xf32>
    %c255_i32 = arith.constant 255 : i32
    %90 = tpu.dynamic_rotate %53 by %c255_i32 dim 1 : vector<16x256xf32>, i32 -> vector<16x256xf32>
    %91 = vector.broadcast %19 : vector<1x256xf32> to vector<16x256xf32>
    %92 = arith.mulf %90, %91 : vector<16x256xf32>
    %c5 = arith.constant 5 : index
    %c0_32 = arith.constant 0 : index
    %c0_33 = arith.constant 0 : index
    %93 = vector.load %arg5[%c5, %c0_32, %c0_33] : memref<9x16x16xbf16, #tpu.memory_space<vmem>>, vector<1x16x16xbf16>
    %94 = vector.shape_cast %93 : vector<1x16x16xbf16> to vector<16x16xbf16>
    %95 = arith.truncf %92 : vector<16x256xf32> to vector<16x256xbf16>
    %cst_34 = arith.constant dense<0.000000e+00> : vector<16x256xf32>
    %96 = tpu.matmul %94, %95, %cst_34 {dimension_numbers = #tpu.dot_dimension_numbers<[1], [0], [0], [1], [0, 0, 1, 1], [], []>} : vector<16x16xbf16>, vector<16x256xbf16>, vector<16x256xf32> -> vector<16x256xf32>
    %97 = arith.addf %89, %96 : vector<16x256xf32>
    %c241_i32 = arith.constant 241 : i32
    %98 = tpu.dynamic_rotate %53 by %c241_i32 dim 1 : vector<16x256xf32>, i32 -> vector<16x256xf32>
    %99 = vector.broadcast %22 : vector<1x256xf32> to vector<16x256xf32>
    %100 = arith.mulf %98, %99 : vector<16x256xf32>
    %c6 = arith.constant 6 : index
    %c0_35 = arith.constant 0 : index
    %c0_36 = arith.constant 0 : index
    %101 = vector.load %arg5[%c6, %c0_35, %c0_36] : memref<9x16x16xbf16, #tpu.memory_space<vmem>>, vector<1x16x16xbf16>
    %102 = vector.shape_cast %101 : vector<1x16x16xbf16> to vector<16x16xbf16>
    %103 = arith.truncf %100 : vector<16x256xf32> to vector<16x256xbf16>
    %cst_37 = arith.constant dense<0.000000e+00> : vector<16x256xf32>
    %104 = tpu.matmul %102, %103, %cst_37 {dimension_numbers = #tpu.dot_dimension_numbers<[1], [0], [0], [1], [0, 0, 1, 1], [], []>} : vector<16x16xbf16>, vector<16x256xbf16>, vector<16x256xf32> -> vector<16x256xf32>
    %105 = arith.addf %97, %104 : vector<16x256xf32>
    %c240_i32_38 = arith.constant 240 : i32
    %106 = tpu.dynamic_rotate %53 by %c240_i32_38 dim 1 : vector<16x256xf32>, i32 -> vector<16x256xf32>
    %107 = vector.broadcast %11 : vector<1x256xf32> to vector<16x256xf32>
    %108 = arith.mulf %106, %107 : vector<16x256xf32>
    %c7 = arith.constant 7 : index
    %c0_39 = arith.constant 0 : index
    %c0_40 = arith.constant 0 : index
    %109 = vector.load %arg5[%c7, %c0_39, %c0_40] : memref<9x16x16xbf16, #tpu.memory_space<vmem>>, vector<1x16x16xbf16>
    %110 = vector.shape_cast %109 : vector<1x16x16xbf16> to vector<16x16xbf16>
    %111 = arith.truncf %108 : vector<16x256xf32> to vector<16x256xbf16>
    %cst_41 = arith.constant dense<0.000000e+00> : vector<16x256xf32>
    %112 = tpu.matmul %110, %111, %cst_41 {dimension_numbers = #tpu.dot_dimension_numbers<[1], [0], [0], [1], [0, 0, 1, 1], [], []>} : vector<16x16xbf16>, vector<16x256xbf16>, vector<16x256xf32> -> vector<16x256xf32>
    %113 = arith.addf %105, %112 : vector<16x256xf32>
    %c239_i32 = arith.constant 239 : i32
    %114 = tpu.dynamic_rotate %53 by %c239_i32 dim 1 : vector<16x256xf32>, i32 -> vector<16x256xf32>
    %115 = vector.broadcast %23 : vector<1x256xf32> to vector<16x256xf32>
    %116 = arith.mulf %114, %115 : vector<16x256xf32>
    %c8 = arith.constant 8 : index
    %c0_42 = arith.constant 0 : index
    %c0_43 = arith.constant 0 : index
    %117 = vector.load %arg5[%c8, %c0_42, %c0_43] : memref<9x16x16xbf16, #tpu.memory_space<vmem>>, vector<1x16x16xbf16>
    %118 = vector.shape_cast %117 : vector<1x16x16xbf16> to vector<16x16xbf16>
    %119 = arith.truncf %116 : vector<16x256xf32> to vector<16x256xbf16>
    %cst_44 = arith.constant dense<0.000000e+00> : vector<16x256xf32>
    %120 = tpu.matmul %118, %119, %cst_44 {dimension_numbers = #tpu.dot_dimension_numbers<[1], [0], [0], [1], [0, 0, 1, 1], [], []>} : vector<16x16xbf16>, vector<16x256xbf16>, vector<16x256xf32> -> vector<16x256xf32>
    %121 = arith.addf %113, %120 : vector<16x256xf32>
    %cst_45 = arith.constant dense<0.000000e+00> : vector<16xf32>
    %122 = vector.multi_reduction <add>, %121, %cst_45 [1] : vector<16x256xf32> to vector<16xf32>
    %123 = vector.shape_cast %122 : vector<16xf32> to vector<16x1xf32>
    %cst_46 = arith.constant 3.906250e-03 : f32
    %124 = vector.broadcast %cst_46 : f32 to vector<16x1xf32>
    %125 = arith.mulf %123, %124 : vector<16x1xf32>
    %126 = vector.broadcast %125 : vector<16x1xf32> to vector<16x256xf32>
    %127 = arith.subf %121, %126 : vector<16x256xf32>
    %128 = arith.mulf %127, %127 : vector<16x256xf32>
    %cst_47 = arith.constant dense<0.000000e+00> : vector<16xf32>
    %129 = vector.multi_reduction <add>, %128, %cst_47 [1] : vector<16x256xf32> to vector<16xf32>
    %130 = vector.shape_cast %129 : vector<16xf32> to vector<16x1xf32>
    %cst_48 = arith.constant 0.00392156886 : f32
    %131 = vector.broadcast %cst_48 : f32 to vector<16x1xf32>
    %132 = arith.mulf %130, %131 : vector<16x1xf32>
    %133 = math.sqrt %132 : vector<16x1xf32>
    %cst_49 = arith.constant 9.99999974E-6 : f32
    %134 = vector.broadcast %cst_49 : f32 to vector<16x1xf32>
    %135 = arith.addf %133, %134 : vector<16x1xf32>
    %136 = arith.divf %29, %135 : vector<16x1xf32>
    %137 = vector.broadcast %136 : vector<16x1xf32> to vector<16x256xf32>
    %138 = arith.mulf %127, %137 : vector<16x256xf32>
    %139 = vector.broadcast %28 : vector<16x1xf32> to vector<16x256xf32>
    %140 = arith.addf %138, %139 : vector<16x256xf32>
    %cst_50 = arith.constant 0.000000e+00 : f32
    %141 = vector.broadcast %cst_50 : f32 to vector<16x256xf32>
    %142 = arith.cmpf oge, %140, %141 : vector<16x256xf32>
    %cst_51 = arith.constant 0.00999999977 : f32
    %143 = vector.broadcast %cst_51 : f32 to vector<16x256xf32>
    %144 = arith.mulf %143, %140 : vector<16x256xf32>
    %145 = arith.select %142, %140, %144 : vector<16x256xi1>, vector<16x256xf32>
    %c17_i32_52 = arith.constant 17 : i32
    %146 = tpu.dynamic_rotate %145 by %c17_i32_52 dim 1 : vector<16x256xf32>, i32 -> vector<16x256xf32>
    %147 = vector.broadcast %20 : vector<1x256xf32> to vector<16x256xf32>
    %148 = arith.mulf %146, %147 : vector<16x256xf32>
    %c0_53 = arith.constant 0 : index
    %c0_54 = arith.constant 0 : index
    %c0_55 = arith.constant 0 : index
    %149 = vector.load %arg6[%c0_53, %c0_54, %c0_55] : memref<9x16x16xbf16, #tpu.memory_space<vmem>>, vector<1x16x16xbf16>
    %150 = vector.shape_cast %149 : vector<1x16x16xbf16> to vector<16x16xbf16>
    %151 = arith.truncf %148 : vector<16x256xf32> to vector<16x256xbf16>
    %cst_56 = arith.constant dense<0.000000e+00> : vector<16x256xf32>
    %152 = tpu.matmul %150, %151, %cst_56 {dimension_numbers = #tpu.dot_dimension_numbers<[1], [0], [0], [1], [0, 0, 1, 1], [], []>} : vector<16x16xbf16>, vector<16x256xbf16>, vector<16x256xf32> -> vector<16x256xf32>
    %c16_i32_57 = arith.constant 16 : i32
    %153 = tpu.dynamic_rotate %145 by %c16_i32_57 dim 1 : vector<16x256xf32>, i32 -> vector<16x256xf32>
    %154 = vector.broadcast %7 : vector<1x256xf32> to vector<16x256xf32>
    %155 = arith.mulf %153, %154 : vector<16x256xf32>
    %c1_58 = arith.constant 1 : index
    %c0_59 = arith.constant 0 : index
    %c0_60 = arith.constant 0 : index
    %156 = vector.load %arg6[%c1_58, %c0_59, %c0_60] : memref<9x16x16xbf16, #tpu.memory_space<vmem>>, vector<1x16x16xbf16>
    %157 = vector.shape_cast %156 : vector<1x16x16xbf16> to vector<16x16xbf16>
    %158 = arith.truncf %155 : vector<16x256xf32> to vector<16x256xbf16>
    %cst_61 = arith.constant dense<0.000000e+00> : vector<16x256xf32>
    %159 = tpu.matmul %157, %158, %cst_61 {dimension_numbers = #tpu.dot_dimension_numbers<[1], [0], [0], [1], [0, 0, 1, 1], [], []>} : vector<16x16xbf16>, vector<16x256xbf16>, vector<16x256xf32> -> vector<16x256xf32>
    %160 = arith.addf %152, %159 : vector<16x256xf32>
    %c15_i32_62 = arith.constant 15 : i32
    %161 = tpu.dynamic_rotate %145 by %c15_i32_62 dim 1 : vector<16x256xf32>, i32 -> vector<16x256xf32>
    %162 = vector.broadcast %21 : vector<1x256xf32> to vector<16x256xf32>
    %163 = arith.mulf %161, %162 : vector<16x256xf32>
    %c2_63 = arith.constant 2 : index
    %c0_64 = arith.constant 0 : index
    %c0_65 = arith.constant 0 : index
    %164 = vector.load %arg6[%c2_63, %c0_64, %c0_65] : memref<9x16x16xbf16, #tpu.memory_space<vmem>>, vector<1x16x16xbf16>
    %165 = vector.shape_cast %164 : vector<1x16x16xbf16> to vector<16x16xbf16>
    %166 = arith.truncf %163 : vector<16x256xf32> to vector<16x256xbf16>
    %cst_66 = arith.constant dense<0.000000e+00> : vector<16x256xf32>
    %167 = tpu.matmul %165, %166, %cst_66 {dimension_numbers = #tpu.dot_dimension_numbers<[1], [0], [0], [1], [0, 0, 1, 1], [], []>} : vector<16x16xbf16>, vector<16x256xbf16>, vector<16x256xf32> -> vector<16x256xf32>
    %168 = arith.addf %160, %167 : vector<16x256xf32>
    %c1_i32_67 = arith.constant 1 : i32
    %169 = tpu.dynamic_rotate %145 by %c1_i32_67 dim 1 : vector<16x256xf32>, i32 -> vector<16x256xf32>
    %170 = vector.broadcast %15 : vector<1x256xf32> to vector<16x256xf32>
    %171 = arith.mulf %169, %170 : vector<16x256xf32>
    %c3_68 = arith.constant 3 : index
    %c0_69 = arith.constant 0 : index
    %c0_70 = arith.constant 0 : index
    %172 = vector.load %arg6[%c3_68, %c0_69, %c0_70] : memref<9x16x16xbf16, #tpu.memory_space<vmem>>, vector<1x16x16xbf16>
    %173 = vector.shape_cast %172 : vector<1x16x16xbf16> to vector<16x16xbf16>
    %174 = arith.truncf %171 : vector<16x256xf32> to vector<16x256xbf16>
    %cst_71 = arith.constant dense<0.000000e+00> : vector<16x256xf32>
    %175 = tpu.matmul %173, %174, %cst_71 {dimension_numbers = #tpu.dot_dimension_numbers<[1], [0], [0], [1], [0, 0, 1, 1], [], []>} : vector<16x16xbf16>, vector<16x256xbf16>, vector<16x256xf32> -> vector<16x256xf32>
    %176 = arith.addf %168, %175 : vector<16x256xf32>
    %c4_72 = arith.constant 4 : index
    %c0_73 = arith.constant 0 : index
    %c0_74 = arith.constant 0 : index
    %177 = vector.load %arg6[%c4_72, %c0_73, %c0_74] : memref<9x16x16xbf16, #tpu.memory_space<vmem>>, vector<1x16x16xbf16>
    %178 = vector.shape_cast %177 : vector<1x16x16xbf16> to vector<16x16xbf16>
    %179 = arith.truncf %145 : vector<16x256xf32> to vector<16x256xbf16>
    %cst_75 = arith.constant dense<0.000000e+00> : vector<16x256xf32>
    %180 = tpu.matmul %178, %179, %cst_75 {dimension_numbers = #tpu.dot_dimension_numbers<[1], [0], [0], [1], [0, 0, 1, 1], [], []>} : vector<16x16xbf16>, vector<16x256xbf16>, vector<16x256xf32> -> vector<16x256xf32>
    %181 = arith.addf %176, %180 : vector<16x256xf32>
    %c255_i32_76 = arith.constant 255 : i32
    %182 = tpu.dynamic_rotate %145 by %c255_i32_76 dim 1 : vector<16x256xf32>, i32 -> vector<16x256xf32>
    %183 = vector.broadcast %19 : vector<1x256xf32> to vector<16x256xf32>
    %184 = arith.mulf %182, %183 : vector<16x256xf32>
    %c5_77 = arith.constant 5 : index
    %c0_78 = arith.constant 0 : index
    %c0_79 = arith.constant 0 : index
    %185 = vector.load %arg6[%c5_77, %c0_78, %c0_79] : memref<9x16x16xbf16, #tpu.memory_space<vmem>>, vector<1x16x16xbf16>
    %186 = vector.shape_cast %185 : vector<1x16x16xbf16> to vector<16x16xbf16>
    %187 = arith.truncf %184 : vector<16x256xf32> to vector<16x256xbf16>
    %cst_80 = arith.constant dense<0.000000e+00> : vector<16x256xf32>
    %188 = tpu.matmul %186, %187, %cst_80 {dimension_numbers = #tpu.dot_dimension_numbers<[1], [0], [0], [1], [0, 0, 1, 1], [], []>} : vector<16x16xbf16>, vector<16x256xbf16>, vector<16x256xf32> -> vector<16x256xf32>
    %189 = arith.addf %181, %188 : vector<16x256xf32>
    %c241_i32_81 = arith.constant 241 : i32
    %190 = tpu.dynamic_rotate %145 by %c241_i32_81 dim 1 : vector<16x256xf32>, i32 -> vector<16x256xf32>
    %191 = vector.broadcast %22 : vector<1x256xf32> to vector<16x256xf32>
    %192 = arith.mulf %190, %191 : vector<16x256xf32>
    %c6_82 = arith.constant 6 : index
    %c0_83 = arith.constant 0 : index
    %c0_84 = arith.constant 0 : index
    %193 = vector.load %arg6[%c6_82, %c0_83, %c0_84] : memref<9x16x16xbf16, #tpu.memory_space<vmem>>, vector<1x16x16xbf16>
    %194 = vector.shape_cast %193 : vector<1x16x16xbf16> to vector<16x16xbf16>
    %195 = arith.truncf %192 : vector<16x256xf32> to vector<16x256xbf16>
    %cst_85 = arith.constant dense<0.000000e+00> : vector<16x256xf32>
    %196 = tpu.matmul %194, %195, %cst_85 {dimension_numbers = #tpu.dot_dimension_numbers<[1], [0], [0], [1], [0, 0, 1, 1], [], []>} : vector<16x16xbf16>, vector<16x256xbf16>, vector<16x256xf32> -> vector<16x256xf32>
    %197 = arith.addf %189, %196 : vector<16x256xf32>
    %c240_i32_86 = arith.constant 240 : i32
    %198 = tpu.dynamic_rotate %145 by %c240_i32_86 dim 1 : vector<16x256xf32>, i32 -> vector<16x256xf32>
    %199 = vector.broadcast %11 : vector<1x256xf32> to vector<16x256xf32>
    %200 = arith.mulf %198, %199 : vector<16x256xf32>
    %c7_87 = arith.constant 7 : index
    %c0_88 = arith.constant 0 : index
    %c0_89 = arith.constant 0 : index
    %201 = vector.load %arg6[%c7_87, %c0_88, %c0_89] : memref<9x16x16xbf16, #tpu.memory_space<vmem>>, vector<1x16x16xbf16>
    %202 = vector.shape_cast %201 : vector<1x16x16xbf16> to vector<16x16xbf16>
    %203 = arith.truncf %200 : vector<16x256xf32> to vector<16x256xbf16>
    %cst_90 = arith.constant dense<0.000000e+00> : vector<16x256xf32>
    %204 = tpu.matmul %202, %203, %cst_90 {dimension_numbers = #tpu.dot_dimension_numbers<[1], [0], [0], [1], [0, 0, 1, 1], [], []>} : vector<16x16xbf16>, vector<16x256xbf16>, vector<16x256xf32> -> vector<16x256xf32>
    %205 = arith.addf %197, %204 : vector<16x256xf32>
    %c239_i32_91 = arith.constant 239 : i32
    %206 = tpu.dynamic_rotate %145 by %c239_i32_91 dim 1 : vector<16x256xf32>, i32 -> vector<16x256xf32>
    %207 = vector.broadcast %23 : vector<1x256xf32> to vector<16x256xf32>
    %208 = arith.mulf %206, %207 : vector<16x256xf32>
    %c8_92 = arith.constant 8 : index
    %c0_93 = arith.constant 0 : index
    %c0_94 = arith.constant 0 : index
    %209 = vector.load %arg6[%c8_92, %c0_93, %c0_94] : memref<9x16x16xbf16, #tpu.memory_space<vmem>>, vector<1x16x16xbf16>
    %210 = vector.shape_cast %209 : vector<1x16x16xbf16> to vector<16x16xbf16>
    %211 = arith.truncf %208 : vector<16x256xf32> to vector<16x256xbf16>
    %cst_95 = arith.constant dense<0.000000e+00> : vector<16x256xf32>
    %212 = tpu.matmul %210, %211, %cst_95 {dimension_numbers = #tpu.dot_dimension_numbers<[1], [0], [0], [1], [0, 0, 1, 1], [], []>} : vector<16x16xbf16>, vector<16x256xbf16>, vector<16x256xf32> -> vector<16x256xf32>
    %213 = arith.addf %205, %212 : vector<16x256xf32>
    %c0_96 = arith.constant 0 : index
    %c0_97 = arith.constant 0 : index
    %214 = vector.load %arg4[%c0_96, %c0_97] : memref<16x16xbf16, #tpu.memory_space<vmem>>, vector<16x16xbf16>
    %c0_98 = arith.constant 0 : index
    %c0_99 = arith.constant 0 : index
    %c0_100 = arith.constant 0 : index
    %215 = vector.load %arg1[%c0_98, %c0_99, %c0_100] : memref<1x16x256xf32, #tpu.memory_space<vmem>>, vector<1x16x256xf32>
    %216 = vector.shape_cast %215 : vector<1x16x256xf32> to vector<16x256xf32>
    %217 = arith.truncf %216 : vector<16x256xf32> to vector<16x256xbf16>
    %cst_101 = arith.constant dense<0.000000e+00> : vector<16x256xf32>
    %218 = tpu.matmul %214, %217, %cst_101 {dimension_numbers = #tpu.dot_dimension_numbers<[1], [0], [0], [1], [0, 0, 1, 1], [], []>} : vector<16x16xbf16>, vector<16x256xbf16>, vector<16x256xf32> -> vector<16x256xf32>
    %219 = arith.addf %213, %218 : vector<16x256xf32>
    %220 = vector.extract_strided_slice %219 {offsets = [0, 0], sizes = [8, 256], strides = [1, 1]} : vector<16x256xf32> to vector<8x256xf32>
    %c0_102 = arith.constant 0 : index
    %c0_103 = arith.constant 0 : index
    %c0_104 = arith.constant 0 : index
    %221 = vector.load %arg7[%c0_102, %c0_103, %c0_104] : memref<1x8x256xf32, #tpu.memory_space<vmem>>, vector<1x8x256xf32>
    %222 = vector.shape_cast %221 : vector<1x8x256xf32> to vector<8x256xf32>
    %223 = vector.shape_cast %220 : vector<8x256xf32> to vector<1x8x256xf32>
    tpu.vector_store %arg7[%c0_102, %c0_103, %c0_104], %223 {strides = array<i32>} : memref<1x8x256xf32, #tpu.memory_space<vmem>>, vector<1x8x256xf32>,
    return
  }
  func.func @transform_0(%arg0: i32) -> (i32, i32, i32) {
    %c0_i32 = arith.constant 0 : i32
    %c0_i32_0 = arith.constant 0 : i32
    %c0_i32_1 = arith.constant 0 : i32
    return %arg0, %c0_i32, %c0_i32_0 : i32, i32, i32
  }
  func.func @transform_1(%arg0: i32) -> (i32, i32, i32) {
    %c0_i32 = arith.constant 0 : i32
    %c0_i32_0 = arith.constant 0 : i32
    %c0_i32_1 = arith.constant 0 : i32
    return %arg0, %c0_i32, %c0_i32_0 : i32, i32, i32
  }
  func.func @transform_2(%arg0: i32) -> (i32, i32) {
    %c0_i32 = arith.constant 0 : i32
    %c0_i32_0 = arith.constant 0 : i32
    %c0_i32_1 = arith.constant 0 : i32
    return %c0_i32, %c0_i32_0 : i32, i32
  }
  func.func @transform_3(%arg0: i32) -> (i32, i32) {
    %c0_i32 = arith.constant 0 : i32
    %c0_i32_0 = arith.constant 0 : i32
    %c0_i32_1 = arith.constant 0 : i32
    return %c0_i32, %c0_i32_0 : i32, i32
  }
  func.func @transform_4(%arg0: i32) -> (i32, i32, i32) {
    %c0_i32 = arith.constant 0 : i32
    %c0_i32_0 = arith.constant 0 : i32
    %c0_i32_1 = arith.constant 0 : i32
    %c0_i32_2 = arith.constant 0 : i32
    return %c0_i32, %c0_i32_0, %c0_i32_1 : i32, i32, i32
  }
  func.func @transform_5(%arg0: i32) -> (i32, i32, i32) {
    %c0_i32 = arith.constant 0 : i32
    %c0_i32_0 = arith.constant 0 : i32
    %c0_i32_1 = arith.constant 0 : i32
    %c0_i32_2 = arith.constant 0 : i32
    return %c0_i32, %c0_i32_0, %c0_i32_1 : i32, i32, i32
  }
  func.func @transform_6(%arg0: i32) -> (i32, i32, i32) {
    %c0_i32 = arith.constant 0 : i32
    %c0_i32_0 = arith.constant 0 : i32
    %c0_i32_1 = arith.constant 0 : i32
    return %arg0, %c0_i32, %c0_i32_0 : i32, i32, i32
  }
}

</mosaic_0001>

<bundles_post_ra>
// kernel: tpu_custom_call.1
= control target key start
LH: loop header
LB: loop body
LE: loop exit
PB: predicated region body
PF: predicated region fallthrough
CT: control target
= control target key end

     0   :  { %11 = vsyncpa [#allocation3], 0  ;;  %s2905_s0 = inlined_call_operand.hbm [shape: f32[2,16,256], index: 0, kind: input, shape index: {}]   ;;  %s2906_s1 = inlined_call_operand.vmem [shape: f32[2,64,1], index: 1, kind: input, shape index: {}]   ;;  %s2907_s2 = inlined_call_operand.vmem [shape: f32[1,256], index: 2, kind: input, shape index: {}]   ;;  %s2908_s3 = inlined_call_operand.vmem [shape: bf16[16,16], index: 3, kind: input, shape index: {}]   ;;  %s2909_s4 = inlined_call_operand.vmem [shape: bf16[9,16,16], index: 4, kind: input, shape index: {}]   ;;  %s2910_s5 = inlined_call_operand.hbm [shape: bf16[9,16,16], index: 5, kind: input, shape index: {}]   ;;  %s2911_s6 = inlined_call_operand.hbm [shape: f32[2,8,256], index: 6, kind: output, shape index: {}]  }
   0x1   :  { %13 = vsyncpa [#allocation3 + $0x1], 0 }
   0x2   :  { %14 = vsyncpa [#allocation6], 0 }
   0x3   :  { %15 = vsyncpa [#allocation4], 0 }
   0x4   :  { %17 = vsyncpa [#allocation4 + $0x1], 0  ;;  %s2236_s21 = smov 0   ;;  %s2238_s22 = smov 0  }
   0x5   :  { %s2240_s23 = smov 0   ;;  %s2242_s24 = smov 0  }
   0x6 LB: > { %s2257_s25 = sadd.s32 4294967295, %s2184_s24   ;;  %s1786_s26 = sadd.s32 4294967294, %s2184_s24   ;;  %s2184_s24 = sphi %s2242_s24, %s2921_s24   ;;  %s2180_s23 = sphi %s2240_s23, %s2920_s23   ;;  %s2176_s22 = sphi %s2238_s22, %s2919_s22   ;;  %s2172_s21 = sphi %s2236_s21, %s2918_s21  }
   0x7   : > { %p43_p0 = scmp.ne.s32.totalorder %s2176_s22, %s2172_s21  ;;  %p44_p1 = scmp.eq.s32.totalorder %s2257_s25, 0 }
   0x8   : > { %p177_p2 = scmp.eq.s32.totalorder %s2257_s25, 1  ;;  %p183_p3 = scmp.eq.s32.totalorder %s1786_s26, 1 }
   0x9   : > { %p2266_p4 = por %p44_p1, %p43_p0  ;;  %p1787_p5 = scmp.ge.s32.totalorder %s2184_s24, 1 }
   0xa   : > { %p2271_p6 = por %p183_p3, %p43_p0  ;;  %p190_p7 = scmp.lt.s32.totalorder %s2184_s24, 3 }
   0xb   : > { %s210_s7 = sshll.u32 %s2910_s5, 4  ;;  %s2186_s9 = smov [#allocation5]   ;;  %s211_s7 = int_to_ptr.hbm [resolvable:$true] %s210_s7 }
   0xc   : > { %p2279_p8 = pnand %p1787_p5, %p190_p7  ;;  %s212_s10 = sshll.u32 %s2186_s9, 4  ;;  %s213_s10 = int_to_ptr.vmem [resolvable:$true] %s212_s10 }
   0xd   : > { %s2289_s11 = sadd.s32 1, %s2184_s24   ;;  %s2187_s12 = smov 64  }
   0xe   : > { %p1968_p9 = pneg %p2279_p8  ;;  %s2188_s13 = smov 4  }
   0xf   : > { %s27_s14 = ssub.s32 %s2184_s24, %s2289_s11  ;;  %s30_s15 = sadd.s32 1, %s2180_s23 }
  0x10   : > { %p1969_p10 = pnand %p1968_p9, %p44_p1  ;;  %p28_p12 = scmp.eq.s32.totalorder %s27_s14, 0 }
  0x11   : > { %p37_p13 = scmp.ne.s32.totalorder %s2180_s23, %s2176_s22  ;;  %p38_p0 = scmp.eq.s32.totalorder %s2184_s24, 0 }
  0x12   : > { %1971 = dma.hbm_to_vmem [thread:$0]  (!%p1969_p10), %s211_s7, 1152, %s213_s10, [#allocation6], %s2187_s12, %s2187_s12, %s2188_s13  }
  0x13   : > { %p1981_p3 = scmp.lt.s32.totalorder %s2184_s24, 2  ;;  %p39_p5 = por %p38_p0, %p37_p13 }
  0x14   : > { %s2299_s16 = scalar_select %p28_p12, %s2180_s23, %s30_s15  }
  0x15   : > { %p2303_p7 = por %p177_p2, %p37_p13  ;;  %s226_s18 = sand.u32 1, %s2180_s23  }
  0x16   : > { %s1938_s19 = sshll.u32 %s2184_s24, 5  ;;  %s1790_s20 = sshll.u32 %s226_s18, 5 }
  0x17   : > { %s235_s30 = scalar_lea.hbm %s2905_s0, %s1938_s19  ;;  %s230_s9 = scalar_lea.vmem [#allocation2], %s1790_s20 }
  0x18   : > { %s236_s7 = sshll.u32 %s235_s30, 4  ;;  %s238_s10 = sshll.u32 %s230_s9, 4  ;;  %s237_s7 = int_to_ptr.hbm [resolvable:$true] %s236_s7  ;;  %s239_s10 = int_to_ptr.vmem [resolvable:$true] %s238_s10 }
  0x19   : > { %p2314_p9 = pnand %p1981_p3, %p39_p5  ;;  %s227_s13 = scalar_lea.sflag [#allocation3], %s226_s18 }
  0x1a   : > { %s2084_s14 = sshra.s32 %s237_s7, 4  ;;  %s2091_s26 = scalar_lea.hbm %s2905_s0, 64  ;;  %s2085_s14 = int_to_ptr.hbm [resolvable:$true] %s2084_s14 }
  0x1b   : > { %s2086_s15 = scalar_lea.hbm %s2085_s14, 32  ;;  %p2088_p10 = pneg %p2314_p9 }
  0x1c   : > { %p2087_p2 = scmp.ne.s32.totalorder %s2085_s14, %s2086_s15  ;;  %p2092_p0 = scmp.lt.s32.totalorder %s2085_s14, %s2905_s0 }
  0x1d   : > { %p2093_p3 = scmp.lt.s32.totalorder %s2091_s26, %s2086_s15 }
  0x1e   : > { %p2089_p12 = pnand %p2088_p10, %p2087_p2 }
  0x1f   : > { %p2094_p5 = por %p2093_p3, %p2092_p0 }
  0x20   : > { %p2090_p13 = pneg %p2089_p12 }
  0x22   : > { %p2095_p11 = pnand %p2094_p5, %p2090_p13 }
  0x24   : > { %2098 = shalt.err (!%p2095_p11)
}
  0x25   : > { %s2189_s18 = smov 256   ;;  %s2190_s9 = smov 16  }
  0x26   : > { %1975 = dma.hbm_to_vmem [thread:$0]  (!%p2314_p9), %s237_s7, 512, %s239_s10, %s227_s13, %s2189_s18, %s2189_s18, %s2190_s9  }
  0x27   : > { %258 = sbr.rel (%p2279_p8) target bundleno = 1514 (0x5ea), region = 44  ;;  %s2331_s19 = sand.u32 (!%p2279_p8), 1, %s2176_s22  }
  0x28   : > { %s1794_s20 = sshll.u32 (!%p2279_p8), %s2331_s19, 5  ;;  %s261_s14 = scalar_lea.sflag (!%p2279_p8), [#allocation3], %s2331_s19 }
  0x29   : > { %s2335_s15 = scalar_lea.vmem (!%p2279_p8), [#allocation2], %s1794_s20 }
  0x2c   : > { %2159 = dma.done.wait (%p2266_p4), %s261_s14, 512  }
  0x2d   : > { %2161 = vsyncadd (%p2266_p4), %s261_s14, 4294966784 }
  0x2e   : > { %2163 = dma.done.wait (%p44_p1), [#allocation6], 1152  }
  0x2f   : > { %2165 = vsyncadd (%p44_p1), [#allocation6], 4294966144  ;;  %v310_v0 = vld [vmem:[%s2335_s15] sm:$0xff]  ;;  %v311_v1 = vld [vmem:[%s2335_s15 + $0x8] sm:$0xff]  ;;  %p304_p1 = scmp.lt.s32.totalorder %s2257_s25, 1  ;;  %v2191_v20 = vmov 0  }
  0x30   : > { %v362_v2 = vadd.f32 %v311_v1, %v310_v0  ;;  %v312_v3 = vld [vmem:[%s2335_s15 + $0x10] sm:$0xff]  ;;  %v313_v4 = vld [vmem:[%s2335_s15 + $0x18] sm:$0xff]  ;;  %2032 = vset.pattern.permute.xlu0 %v2191_v20  ;;  %2033 = vset.pattern.permute.xlu1 %v2191_v20  ;;  %s2192_s13 = smov 17   ;;  %s2193_s26 = smov 16  }
  0x31   : > { %v365_v5 = vadd.f32 %v313_v4, %v312_v3  ;;  %s305_s27 = scalar_select %p304_p1, %s2257_s25, 1  ;;  %2031 = vset.pattern.permute.xlu2 %v2191_v20 }
  0x32   : > { %363 = vadd.xlane.f32.xlu0 %v362_v2  ;;  %s2194_s29 = smov 15   ;;  %s2195_s30 = smov 1  }
  0x33   : > { %s1939_s8 = sshll.u32 %s305_s27, 6  ;;  %s2196_s18 = smov 127  }
  0x34   : > { %s2370_s12 = scalar_lea.vmem %s2906_s1, %s1939_s8  ;;  %s2197_s9 = smov 113  }
  0x35   : > { %v354_v21 = vld [vmem:[%s2370_s12] sm:$0xff]  ;;  %v355_v22 = vld [vmem:[%s2370_s12 + $0x8] sm:$0xff]  ;;  %v356_v57 = vld [vmem:[%s2370_s12 + $0x10] sm:$0xff]  ;;  %s2198_s20 = smov 112   ;;  %s2199_s14 = smov 111  }
  0x3a   : > { %366 = vadd.xlane.f32.xlu0 %v365_v5 }
  0x4e   : > { %458 = vperm.xlu0 %2032, %v354_v21  }
  0xa5   : > { %v364_v6 = vpop.xlane.xlu0 %363 }
  0xa6   : > { %v368_v7 = vmul.f32 0.00390625, %v364_v6 }
  0xa8   : > { %v2349_v8 = vsub.f32 %v310_v0, %v368_v7  ;;  %v2351_v9 = vsub.f32 %v311_v1, %v368_v7 }
  0xaa   : > { %v374_v10 = vmul.f32 %v2349_v8, %v2349_v8  ;;  %v375_v11 = vmul.f32 %v2351_v9, %v2351_v9 }
  0xac   : > { %v378_v12 = vadd.f32 %v375_v11, %v374_v10 }
  0xad   : > { %v367_v13 = vpop.xlane.xlu0 %366 }
  0xae   : > { %v369_v14 = vmul.f32 0.00390625, %v367_v13  ;;  %379 = vadd.xlane.f32.xlu1 %v378_v12 }
  0xb0   : > { %v2357_v15 = vsub.f32 %v312_v3, %v369_v14  ;;  %v2359_v16 = vsub.f32 %v313_v4, %v369_v14  ;;  %v357_v4 = vld [vmem:[%s2370_s12 + $0x18] sm:$0xff] }
  0xb2   : > { %v376_v17 = vmul.f32 %v2357_v15, %v2357_v15  ;;  %v377_v18 = vmul.f32 %v2359_v16, %v2359_v16 }
  0xb4   : > { %v381_v19 = vadd.f32 %v377_v18, %v376_v17 }
  0xb6   : > { %382 = vadd.xlane.f32.xlu1 %v381_v19 }
  0xc0   : > { %v459_v12 = vpop.permute.xlu0 %458 }
  0xcf   : > { %463 = vperm.xlu1 %2033, %v355_v22  }
 0x121   : > { %v380_v23 = vpop.xlane.xlu1 %379 }
 0x122   : > { %v384_v24 = vmul.f32 0.003921569, %v380_v23 }
 0x124   : > { %2034 = vrsqrt.f32 %v384_v24  ;;  %vm393_vm0 = vcmp.eq.f32.partialorder %v384_v24, inf  ;;  %v396_v37 = vand.u32 2147483648, %v384_v24  ;;  %vm395_vm1 = vcmp.eq.f32.partialorder %v384_v24, 0.0 }
 0x129   : > { %v383_v25 = vpop.xlane.xlu1 %382 }
 0x12a   : > { %v2035_v26 = vpop.eup %2034  ;;  %v385_v27 = vmul.f32 0.003921569, %v383_v25 }
 0x12b   : > { %v387_v28 = vmul.f32 %v2035_v26, %v384_v24 }
 0x12c   : > { %2036 = vrsqrt.f32 %v385_v27  ;;  %vm405_vm2 = vcmp.eq.f32.partialorder %v385_v27, inf  ;;  %v408_v45 = vand.u32 2147483648, %v385_v27  ;;  %vm407_vm3 = vcmp.eq.f32.partialorder %v385_v27, 0.0 }
 0x12d   : > { %v388_v29 = vmul.f32 %v2035_v26, %v387_v28 }
 0x12f   : > { %v389_v30 = vmul.f32 0.5, %v388_v29 }
 0x131   : > { %v390_v31 = vsub.f32 1.5, %v389_v30 }
 0x132   : > { %v2037_v32 = vpop.eup %2036 }
 0x133   : > { %v399_v33 = vmul.f32 %v2037_v32, %v385_v27  ;;  %v391_v34 = vmul.f32 %v2035_v26, %v390_v31  ;;  %v314_v31 = vlaneseq }
 0x135   : > { %v400_v35 = vmul.f32 %v2037_v32, %v399_v33  ;;  %v392_v36 = vmul.f32 %v391_v34, %v384_v24  ;;  %v2455_v33 = vand.u32 127, %v314_v31 }
 0x137   : > { %v401_v38 = vmul.f32 0.5, %v400_v35  ;;  %v394_v39 = vsel %vm393_vm0, %v384_v24, %v392_v36  ;;  %v2200_v35 = vmov 0.0  }
 0x138   : > { %v397_v40 = vsel %vm395_vm1, %v396_v37, %v394_v39  ;;  %vm513_vm1 = vcmp.lt.s32.totalorder %v2455_v33, 16 }
 0x139   : > { %v402_v41 = vsub.f32 1.5, %v401_v38  ;;  %v410_v42 = vadd.f32 1e-05, %v397_v40 }
 0x13b   : > { %v403_v43 = vmul.f32 %v2037_v32, %v402_v41  ;;  %2038 = vrcp.f32 %v410_v42  ;;  %v423_v52 = vand.u32 2147483648, %v410_v42  ;;  %v421_v54 = vand.u32 2147483647, %v410_v42  ;;  %v317_v32 = vld [vmem:[%s2907_s2] sm:$0x3] }
 0x13c   : > { %vm417_vm5 = vweird.f32 %v410_v42  ;;  %vm330_vm0 = vcmp.ge.f32.partialorder %v317_v32, 1.0 }
 0x13d   : > { %v404_v44 = vmul.f32 %v403_v43, %v385_v27  ;;  %v424_v58 = vor.u32 1.1754944e-38, %v423_v52  ;;  %vm422_vm7 = vcmp.eq.f32.partialorder %v421_v54, 8.507059e+37  ;;  %v1801_v36 = vsel %vm330_vm0, 1.0, %v2200_v35 }
 0x13e   : > { %v2460_v37 = vperm.slane %v1801_v36, 0 }
 0x13f   : > { %v406_v46 = vsel %vm405_vm2, %v385_v27, %v404_v44  ;;  %vm318_vm2 = vcmp.ge.s32.totalorder %v2455_v33, 16 }
 0x140   : > { %v409_v47 = vsel %vm407_vm3, %v408_v45, %v406_v46  ;;  %v2465_v40 = vsel %vm318_vm2, 1.0, %v2200_v35  ;;  %vm532_vm3 = vcmask 130048  }
 0x141   : > { %v2039_v48 = vpop.eup %2038  ;;  %v411_v49 = vadd.f32 1e-05, %v409_v47  ;;  %v464_v22 = vpop.permute.xlu1 %463  ;;  %v341_v46 = vmul.f32 %v2465_v40, %v2460_v37 }
 0x142   : > { %v413_v50 = vmul.f32 %v2039_v48, %v410_v42  ;;  %vm418_vm4 = vweird.f32 %v2039_v48  ;;  %v2467_v42 = vperm.slane %v1801_v36, 1 }
 0x143   : > { %2040 = vrcp.f32 %v411_v49  ;;  %vm419_vm6 = vmor %vm417_vm5, %vm418_vm4  ;;  %v438_v0 = vand.u32 2147483648, %v411_v49  ;;  %v436_v2 = vand.u32 2147483647, %v411_v49  ;;  %vm432_vm9 = vweird.f32 %v411_v49 }
 0x144   : > { %v414_v51 = vsub.f32 1.0, %v413_v50  ;;  %v1941_v50 = vld [vmem:[%s2909_s4 + $0x8] sm:$0xff]  ;;  %vm490_vm4 = vcmp.lt.s32.totalorder %v2455_v33, 17  ;;  %v2483_v52 = vperm.slane %v341_v46, 0  ;;  %vm333_vm5 = vcmp.le.f32.partialorder %v317_v32, 14.0  ;;  %v1942_v32 = vld [vmem:[%s2909_s4 + $0x10] sm:$0xff] }
 0x145   : > { %v439_v5 = vor.u32 1.1754944e-38, %v438_v0  ;;  %vm437_vm11 = vcmp.eq.f32.partialorder %v436_v2, 8.507059e+37 }
 0x146   : > { %v415_v53 = vmul.f32 %v2039_v48, %v414_v51 }
 0x148   : > { %v416_v55 = vadd.f32 %v2039_v48, %v415_v53  ;;  %v2486_v53 = vperm.slane %v2467_v42, 0 }
 0x149   : > { %v2041_v56 = vpop.eup %2040 }
 0x14a   : > { %v420_v59 = vsel %vm419_vm6, %v2039_v48, %v416_v55  ;;  %v428_v60 = vmul.f32 %v2041_v56, %v411_v49  ;;  %vm433_vm8 = vweird.f32 %v2041_v56  ;;  %vm608_vm6 = vcmp.lt.s32.totalorder %v2455_v33, 15 }
 0x14b   : > { %v425_v61 = vsel %vm422_vm7, %v424_v58, %v420_v59  ;;  %vm434_vm10 = vmor %vm432_vm9, %vm433_vm8  ;;  %vm672_vm7 = vcmp.lt.s32.totalorder %v2455_v33, 1  ;;  %vm779_vm8 = vcmp.lt.s32.totalorder %v2455_v33, 127 }
 0x14c   : > { %v426_v62 = vmul.f32 %v425_v61, %v356_v57  ;;  %v429_v63 = vsub.f32 1.0, %v428_v60 }
 0x14e   : > { %444 = vperm.xlu2 %2031, %v426_v62   ;;  %v430_v1 = vmul.f32 %v2041_v56, %v429_v63 }
 0x150   : > { %v431_v3 = vadd.f32 %v2041_v56, %v430_v1  ;;  %v1802_v1 = vsel %vm333_vm5, 1.0, %v2200_v35 }
 0x152   : > { %v435_v6 = vsel %vm434_vm10, %v2041_v56, %v431_v3  ;;  %vm841_vm10 = vcmp.lt.s32.totalorder %v2455_v33, 113 }
 0x153   : > { %v440_v7 = vsel %vm437_vm11, %v439_v5, %v435_v6  ;;  %v2506_v5 = vperm.slane %v1802_v1, 0  ;;  %vm905_vm11 = vcmp.lt.s32.totalorder %v2455_v33, 112 }
 0x154   : > { %v441_v10 = vmul.f32 %v440_v7, %v357_v4  ;;  %v1940_v4 = vld [vmem:[%s2909_s4] sm:$0xff] }
 0x156   : > { %449 = vperm.xlu2 %2031, %v441_v10  }
 0x1a8   : > { %v445_v11 = vpop.permute.xlu2 %444 }
 0x1a9   : > { %v452_v13 = vmul.f32 %v445_v11, %v2349_v8  ;;  %v453_v14 = vmul.f32 %v445_v11, %v2351_v9  ;;  %v2510_v11 = vperm.slane %v1802_v1, 1 }
 0x1ab   : > { %v466_v17 = vadd.f32 %v459_v12, %v452_v13  ;;  %v467_v19 = vadd.f32 %v459_v12, %v453_v14  ;;  %v348_v12 = vmul.f32 %v2465_v40, %v2506_v5  ;;  %v2518_v14 = vperm.slane %v2510_v11, 0 }
 0x1ad   : > { %vm470_vm12 = vcmp.ge.f32.partialorder %v466_v17, 0.0  ;;  %v474_v18 = vmul.f32 0.01, %v466_v17  ;;  %v475_v23 = vmul.f32 0.01, %v467_v19  ;;  %vm471_vm13 = vcmp.ge.f32.partialorder %v467_v19, 0.0 }
 0x1ae   : > { %v2515_v13 = vperm.slane %v348_v12, 0 }
 0x1af   : > { %v2378_v20 = vsel %vm470_vm12, %v466_v17, %v474_v18  ;;  %v2386_v28 = vsel %vm471_vm13, %v467_v19, %v475_v23  ;;  %vm967_vm12 = vcmp.lt.s32.totalorder %v2455_v33, 111 }
 0x1b0   : > { %v450_v21 = vpop.permute.xlu2 %449  ;;  %482 = vrot.lane.b32.xlu1 %v2378_v20, %s2192_s13  ;;  %505 = vrot.lane.b32.xlu2 %v2378_v20, %s2193_s26 }
 0x1b1   : > { %v454_v8 = vmul.f32 %v450_v21, %v2357_v15  ;;  %v455_v9 = vmul.f32 %v450_v21, %v2359_v16 }
 0x1b3   : > { %v468_v24 = vadd.f32 %v464_v22, %v454_v8  ;;  %v469_v25 = vadd.f32 %v464_v22, %v455_v9 }
 0x1b5   : > { %vm472_vm14 = vcmp.ge.f32.partialorder %v468_v24, 0.0  ;;  %vm473_vm15 = vcmp.ge.f32.partialorder %v469_v25, 0.0  ;;  %v476_v26 = vmul.f32 0.01, %v468_v24  ;;  %v477_v27 = vmul.f32 0.01, %v469_v25 }
 0x1b7   : > { %v2388_v29 = vsel %vm472_vm14, %v468_v24, %v476_v26  ;;  %v2390_v30 = vsel %vm473_vm15, %v469_v25, %v477_v27 }
 0x1b8   : > { %488 = vrot.lane.b32.xlu0 %v2390_v30, %s2192_s13  ;;  %486 = vrot.lane.b32.xlu1 %v2386_v28, %s2192_s13  ;;  %v730_v31 = vpack.c.bf16 %v2390_v30, %v2386_v28 }
 0x1b9   : > { %507 = vrot.lane.b32.xlu2 %v2388_v29, %s2193_s26 }
 0x1c0   : > { %604 = vrot.lane.b32.xlu0 %v2386_v28, %s2194_s29  ;;  %602 = vrot.lane.b32.xlu1 %v2388_v29, %s2194_s29 }
 0x1c1   : > { %509 = vrot.lane.b32.xlu2 %v2386_v28, %s2193_s26 }
 0x1c8   : > { %666 = vrot.lane.b32.xlu0 %v2388_v29, %s2195_s30  ;;  %664 = vrot.lane.b32.xlu1 %v2378_v20, %s2195_s30 }
 0x1c9   : > { %511 = vrot.lane.b32.xlu2 %v2390_v30, %s2193_s26 }
 0x1d0   : > { %771 = vrot.lane.b32.xlu0 %v2378_v20, %s2196_s18  ;;  %670 = vrot.lane.b32.xlu1 %v2390_v30, %s2195_s30 }
 0x1d1   : > { %484 = vrot.lane.b32.xlu2 %v2388_v29, %s2192_s13 }
 0x1d8   : > { %777 = vrot.lane.b32.xlu0 %v2390_v30, %s2196_s18  ;;  %775 = vrot.lane.b32.xlu1 %v2386_v28, %s2196_s18 }
 0x1d9   : > { %600 = vrot.lane.b32.xlu2 %v2378_v20, %s2194_s29 }
 0x1e0   : > { %837 = vrot.lane.b32.xlu0 %v2386_v28, %s2197_s9  ;;  %835 = vrot.lane.b32.xlu1 %v2388_v29, %s2197_s9 }
 0x1e1   : > { %606 = vrot.lane.b32.xlu2 %v2390_v30, %s2194_s29 }
 0x1e8   : > { %899 = vrot.lane.b32.xlu0 %v2388_v29, %s2198_s20  ;;  %897 = vrot.lane.b32.xlu1 %v2378_v20, %s2198_s20 }
 0x1e9   : > { %668 = vrot.lane.b32.xlu2 %v2386_v28, %s2195_s30 }
 0x1f0   : > { %959 = vrot.lane.b32.xlu0 %v2378_v20, %s2199_s14  ;;  %903 = vrot.lane.b32.xlu1 %v2390_v30, %s2198_s20 }
 0x1f1   : > { %773 = vrot.lane.b32.xlu2 %v2388_v29, %s2196_s18 }
 0x1f8   : > { %965 = vrot.lane.b32.xlu0 %v2390_v30, %s2199_s14  ;;  %963 = vrot.lane.b32.xlu1 %v2386_v28, %s2199_s14 }
 0x1f9   : > { %833 = vrot.lane.b32.xlu2 %v2378_v20, %s2197_s9 }
 0x201   : > { %839 = vrot.lane.b32.xlu2 %v2390_v30, %s2197_s9 }
 0x209   : > { %901 = vrot.lane.b32.xlu2 %v2386_v28, %s2198_s20 }
 0x20a   : > { %v506_v15 = vpop.permute.xlu2 %505 }
 0x211   : > { %961 = vrot.lane.b32.xlu2 %v2388_v29, %s2199_s14 }
 0x213   : > { %v508_v16 = vpop.permute.xlu2 %507 }
 0x21b   : > { %v510_v34 = vpop.permute.xlu2 %509 }
 0x21c   : > { %v516_v38 = vsel %vm513_vm1, %v510_v34, %v506_v15  ;;  %v514_v44 = vsel %vm513_vm1, %v506_v15, %v510_v34 }
 0x21d   : > { %v518_v48 = vmul.f32 %v2465_v40, %v516_v38 }
 0x222   : > { %v483_v39 = vpop.permute.xlu1 %482 }
 0x223   : > { %v512_v41 = vpop.permute.xlu2 %511 }
 0x224   : > { %v517_v43 = vsel %vm513_vm1, %v512_v41, %v508_v16  ;;  %v515_v45 = vsel %vm513_vm1, %v508_v16, %v512_v41  ;;  %v729_v16 = vpack.c.bf16 %v2388_v29, %v2378_v20 }
 0x225   : > { %v526_v47 = vpack.c.bf16 %v515_v45, %v514_v44  ;;  %v520_v49 = vmul.f32 %v2465_v40, %v517_v43 }
 0x227   : > { %557 = vmatpush.bf16.msra.mxu1 %v526_v47  ;;  %v525_v51 = vpack.c.bf16 %v520_v49, %v518_v48  ;;  %v1943_v47 = vld [vmem:[%s2909_s4 + $0x18] sm:$0xff] }
 0x229   : > { %543 = vmatpush.bf16.msra.mxu0 %v525_v51 }
 0x22a   : > { %v487_v54 = vpop.permute.xlu1 %486  ;;  %v489_v55 = vpop.permute.xlu0 %488  ;;  %1810 = vmatmul.msk.bf16.vlgmr.msra.gmra.mxu1 %vm532_vm3, %v1941_v50 }
 0x22b   : > { %v491_v56 = vsel %vm490_vm4, %v483_v39, %v487_v54  ;;  %v493_v57 = vsel %vm490_vm4, %v487_v54, %v483_v39  ;;  %v485_v58 = vpop.permute.xlu2 %484 }
 0x22c   : > { %v492_v59 = vsel %vm490_vm4, %v485_v58, %v489_v55  ;;  %v494_v60 = vsel %vm490_vm4, %v489_v55, %v485_v58  ;;  %1809 = vmatmul.msk.bf16.vlgmr.msra.gmra.mxu0 %vm532_vm3, %v1941_v50  ;;  %v497_v61 = vmul.f32 %v2483_v52, %v493_v57  ;;  %v498_v62 = vmul.f32 %v2486_v53, %v491_v56 }
 0x22d   : > { %v499_v63 = vmul.f32 %v2483_v52, %v494_v60  ;;  %v500_v0 = vmul.f32 %v2486_v53, %v492_v59  ;;  %v316_v50 = vadd.s32 128, %v2455_v33  ;;  %v1958_v33 = vld [vmem:[%s2908_s3] sm:$0xff] }
 0x22f   : > { %v503_v2 = vpack.c.bf16 %v499_v63, %v497_v61  ;;  %v504_v3 = vpack.c.bf16 %v500_v0, %v498_v62  ;;  %vm325_vm9 = vcmp.lt.s32.totalorder %v316_v50, 240  ;;  %v1944_v0 = vld [vmem:[%s2909_s4 + $0x20] sm:$0xff] }
 0x230   : > { %v2577_v1 = vsel %vm325_vm9, 1.0, %v2200_v35 }
 0x231   : > { %579 = vmatpush.bf16.msra.mxu2 %v503_v2  ;;  %593 = vmatpush.bf16.msra.mxu3 %v504_v3 }
 0x232   : > { %v603_v6 = vpop.permute.xlu1 %602  ;;  %v605_v7 = vpop.permute.xlu0 %604 }
 0x233   : > { %v601_v10 = vpop.permute.xlu2 %600 }
 0x234   : > { %1815 = vmatmul.msk.bf16.vlgmr.msra.gmra.mxu2 %vm532_vm3, %v1940_v4  ;;  %1816 = vmatmul.msk.bf16.vlgmr.msra.gmra.mxu3 %vm532_vm3, %v1940_v4  ;;  %v609_v17 = vsel %vm608_vm6, %v601_v10, %v605_v7  ;;  %v611_v18 = vsel %vm608_vm6, %v605_v7, %v601_v10  ;;  %v1945_v7 = vld [vmem:[%s2909_s4 + $0x28] sm:$0xff]  ;;  %v2588_v10 = vperm.slane %v2460_v37, 0 }
 0x235   : > { %v615_v23 = vmul.f32 %v2515_v13, %v611_v18  ;;  %v616_v24 = vmul.f32 %v2518_v14, %v609_v17 }
 0x23a   : > { %v665_v19 = vpop.permute.xlu1 %664  ;;  %v667_v21 = vpop.permute.xlu0 %666 }
 0x23b   : > { %v607_v22 = vpop.permute.xlu2 %606 }
 0x23c   : > { %v610_v8 = vsel %vm608_vm6, %v603_v6, %v607_v22  ;;  %v612_v9 = vsel %vm608_vm6, %v607_v22, %v603_v6  ;;  %v351_v6 = vmul.f32 %v2577_v1, %v2467_v42 }
 0x23d   : > { %v617_v25 = vmul.f32 %v2515_v13, %v612_v9  ;;  %v618_v26 = vmul.f32 %v2518_v14, %v610_v8 }
 0x23e   : > { %v2590_v35 = vperm.slane %v351_v6, 0 }
 0x23f   : > { %v622_v27 = vpack.c.bf16 %v617_v25, %v615_v23  ;;  %v623_v15 = vpack.c.bf16 %v618_v26, %v616_v24 }
 0x241   : > { %639 = vmatpush.bf16.msrb.mxu0 %v622_v27  ;;  %653 = vmatpush.bf16.msrb.mxu1 %v623_v15  ;;  %v1946_v15 = vld [vmem:[%s2909_s4 + $0x30] sm:$0xff] }
 0x242   : > { %v671_v34 = vpop.permute.xlu1 %670  ;;  %v772_v36 = vpop.permute.xlu0 %771 }
 0x243   : > { %v674_v38 = vsel %vm672_vm7, %v667_v21, %v671_v34  ;;  %v676_v20 = vsel %vm672_vm7, %v671_v34, %v667_v21  ;;  %v669_v29 = vpop.permute.xlu2 %668 }
 0x244   : > { %v679_v28 = vmul.f32 %v676_v20, %v2460_v37  ;;  %v680_v30 = vmul.f32 %v674_v38, %v2467_v42  ;;  %v673_v39 = vsel %vm672_vm7, %v665_v19, %v669_v29  ;;  %v675_v41 = vsel %vm672_vm7, %v669_v29, %v665_v19  ;;  %1823 = vmatmul.msk.bf16.vlgmr.msrb.gmra.mxu0 %vm532_vm3, %v1942_v32 }
 0x245   : > { %746 = vmatpush.bf16.msra.mxu0 %v729_v16  ;;  %760 = vmatpush.bf16.msra.mxu1 %v730_v31  ;;  %v677_v43 = vmul.f32 %v675_v41, %v2460_v37  ;;  %v678_v44 = vmul.f32 %v673_v39, %v2467_v42 }
 0x246   : > { %1824 = vmatmul.msk.bf16.vlgmr.msrb.gmra.mxu1 %vm532_vm3, %v1942_v32 }
 0x247   : > { %v684_v45 = vpack.c.bf16 %v679_v28, %v677_v43  ;;  %v685_v46 = vpack.c.bf16 %v680_v30, %v678_v44  ;;  %v353_v28 = vmul.f32 %v2577_v1, %v2510_v11  ;;  %v2626_v43 = vperm.slane %v2506_v5, 0 }
 0x249   : > { %701 = vmatpush.bf16.msrb.mxu2 %v684_v45  ;;  %715 = vmatpush.bf16.msrb.mxu3 %v685_v46  ;;  %v2628_v44 = vperm.slane %v353_v28, 0  ;;  %v1947_v45 = vld [vmem:[%s2909_s4 + $0x38] sm:$0xff] }
 0x24a   : > { %v776_v48 = vpop.permute.xlu1 %775  ;;  %v778_v49 = vpop.permute.xlu0 %777 }
 0x24b   : > { %v780_v51 = vsel %vm779_vm8, %v772_v36, %v776_v48  ;;  %v782_v54 = vsel %vm779_vm8, %v776_v48, %v772_v36  ;;  %v774_v55 = vpop.permute.xlu2 %773 }
 0x24c   : > { %v784_v56 = vmul.f32 %v780_v51, %v2506_v5  ;;  %v785_v57 = vmul.f32 %v782_v54, %v2510_v11  ;;  %v781_v58 = vsel %vm779_vm8, %v774_v55, %v778_v49  ;;  %v783_v59 = vsel %vm779_vm8, %v778_v49, %v774_v55  ;;  %1831 = vmatmul.msk.bf16.vlgmr.msrb.gmra.mxu2 %vm532_vm3, %v1943_v47 }
 0x24d   : > { %v786_v60 = vmul.f32 %v781_v58, %v2506_v5  ;;  %v787_v61 = vmul.f32 %v783_v59, %v2510_v11  ;;  %1832 = vmatmul.msk.bf16.vlgmr.msrb.gmra.mxu3 %vm532_vm3, %v1943_v47 }
 0x24f   : > { %v791_v62 = vpack.c.bf16 %v786_v60, %v784_v56  ;;  %v792_v63 = vpack.c.bf16 %v787_v61, %v785_v57  ;;  %v1948_v61 = vld [vmem:[%s2909_s4 + $0x40] sm:$0xff] }
 0x251   : > { %808 = vmatpush.bf16.msra.mxu2 %v791_v62  ;;  %822 = vmatpush.bf16.msra.mxu3 %v792_v63 }
 0x252   : > { %v836_v2 = vpop.permute.xlu1 %835  ;;  %v838_v3 = vpop.permute.xlu0 %837 }
 0x253   : > { %v834_v4 = vpop.permute.xlu2 %833 }
 0x254   : > { %1839 = vmatmul.msk.bf16.vlgmr.msra.gmra.mxu0 %vm532_vm3, %v1944_v0  ;;  %v842_v12 = vsel %vm841_vm10, %v834_v4, %v838_v3  ;;  %v844_v17 = vsel %vm841_vm10, %v838_v3, %v834_v4 }
 0x255   : > { %v848_v9 = vmul.f32 %v2588_v10, %v842_v12  ;;  %v849_v23 = vmul.f32 %v2590_v35, %v844_v17 }
 0x256   : > { %1840 = vmatmul.msk.bf16.vlgmr.msra.gmra.mxu1 %vm532_vm3, %v1944_v0 }
 0x25a   : > { %v898_v18 = vpop.permute.xlu1 %897  ;;  %v900_v19 = vpop.permute.xlu0 %899 }
 0x25b   : > { %v840_v21 = vpop.permute.xlu2 %839 }
 0x25c   : > { %v843_v22 = vsel %vm841_vm10, %v836_v2, %v840_v21  ;;  %v845_v8 = vsel %vm841_vm10, %v840_v21, %v836_v2  ;;  %1847 = vmatmul.msk.bf16.vlgmr.msra.gmra.mxu2 %vm532_vm3, %v1945_v7 }
 0x25d   : > { %v850_v24 = vmul.f32 %v2588_v10, %v843_v22  ;;  %v851_v25 = vmul.f32 %v2590_v35, %v845_v8  ;;  %1848 = vmatmul.msk.bf16.vlgmr.msra.gmra.mxu3 %vm532_vm3, %v1945_v7 }
 0x25f   : > { %v855_v26 = vpack.c.bf16 %v850_v24, %v848_v9  ;;  %v856_v27 = vpack.c.bf16 %v851_v25, %v849_v23 }
 0x261   : > { %872 = vmatpush.bf16.msrb.mxu0 %v855_v26  ;;  %886 = vmatpush.bf16.msrb.mxu1 %v856_v27 }
 0x262   : > { %v904_v16 = vpop.permute.xlu1 %903  ;;  %v960_v31 = vpop.permute.xlu0 %959 }
 0x263   : > { %v907_v32 = vsel %vm905_vm11, %v900_v19, %v904_v16  ;;  %v909_v34 = vsel %vm905_vm11, %v904_v16, %v900_v19  ;;  %v902_v36 = vpop.permute.xlu2 %901 }
 0x264   : > { %v913_v38 = vmul.f32 %v2577_v1, %v909_v34  ;;  %v906_v20 = vsel %vm905_vm11, %v898_v18, %v902_v36  ;;  %v908_v29 = vsel %vm905_vm11, %v902_v36, %v898_v18  ;;  %1855 = vmatmul.msk.bf16.vlgmr.msrb.gmra.mxu0 %vm532_vm3, %v1946_v15 }
 0x265   : > { %v911_v30 = vmul.f32 %v2577_v1, %v908_v29  ;;  %v917_v39 = vpack.c.bf16 %v907_v32, %v906_v20 }
 0x266   : > { %1856 = vmatmul.msk.bf16.vlgmr.msrb.gmra.mxu1 %vm532_vm3, %v1946_v15 }
 0x267   : > { %v918_v41 = vpack.c.bf16 %v913_v38, %v911_v30  ;;  %934 = vmatpush.bf16.msrb.mxu2 %v917_v39 }
 0x269   : > { %948 = vmatpush.bf16.msrb.mxu3 %v918_v41 }
 0x26a   : > { %v964_v46 = vpop.permute.xlu1 %963  ;;  %v966_v47 = vpop.permute.xlu0 %965 }
 0x26b   : > { %v968_v48 = vsel %vm967_vm12, %v960_v31, %v964_v46  ;;  %v970_v49 = vsel %vm967_vm12, %v964_v46, %v960_v31  ;;  %v962_v50 = vpop.permute.xlu2 %961 }
 0x26c   : > { %v974_v51 = vmul.f32 %v2626_v43, %v968_v48  ;;  %v975_v54 = vmul.f32 %v2628_v44, %v970_v49  ;;  %v969_v55 = vsel %vm967_vm12, %v962_v50, %v966_v47  ;;  %v971_v56 = vsel %vm967_vm12, %v966_v47, %v962_v50  ;;  %1863 = vmatmul.msk.bf16.vlgmr.msrb.gmra.mxu2 %vm532_vm3, %v1947_v45 }
 0x26d   : > { %v976_v57 = vmul.f32 %v2626_v43, %v969_v55  ;;  %v977_v58 = vmul.f32 %v2628_v44, %v971_v56  ;;  %1864 = vmatmul.msk.bf16.vlgmr.msrb.gmra.mxu3 %vm532_vm3, %v1947_v45 }
 0x26f   : > { %v981_v59 = vpack.c.bf16 %v976_v57, %v974_v51  ;;  %v982_v60 = vpack.c.bf16 %v977_v58, %v975_v54 }
 0x271   : > { %998 = vmatpush.bf16.msra.mxu0 %v981_v59  ;;  %1012 = vmatpush.bf16.msra.mxu1 %v982_v60 }
 0x274   : > { %1871 = vmatmul.msk.bf16.vlgmr.msra.gmra.mxu0 %vm532_vm3, %v1948_v61 }
 0x276   : > { %1872 = vmatmul.msk.bf16.vlgmr.msra.gmra.mxu1 %vm532_vm3, %v1948_v61 }
 0x2a7   : > { %v559_v63 = vpop.f32.mrf.mxu1 }
 0x2a9   : > { %v545_v62 = vpop.f32.mrf.mxu0 }
 0x2af   : > { %v561_v2 = vpop.f32.mrf.mxu1 }
 0x2b1   : > { %v547_v0 = vpop.f32.mrf.mxu0 }
 0x2b7   : > { %v581_v3 = vpop.f32.mrf.mxu2  ;;  %v595_v4 = vpop.f32.mrf.mxu3 }
 0x2b8   : > { %v582_v15 = vadd.f32 %v581_v3, %v545_v62  ;;  %v596_v31 = vadd.f32 %v595_v4, %v559_v63 }
 0x2bf   : > { %v583_v12 = vpop.f32.mrf.mxu2  ;;  %v597_v17 = vpop.f32.mrf.mxu3 }
 0x2c0   : > { %v584_v30 = vadd.f32 %v583_v12, %v547_v0  ;;  %v598_v45 = vadd.f32 %v597_v17, %v561_v2 }
 0x2c1   : > { %v641_v6 = vpop.f32.mrf.mxu0 }
 0x2c2   : > { %v660_v34 = vadd.f32 %v641_v6, %v582_v15 }
 0x2c3   : > { %v655_v7 = vpop.f32.mrf.mxu1 }
 0x2c4   : > { %v661_v38 = vadd.f32 %v655_v7, %v596_v31 }
 0x2c9   : > { %v643_v18 = vpop.f32.mrf.mxu0 }
 0x2ca   : > { %v662_v48 = vadd.f32 %v643_v18, %v584_v30 }
 0x2cb   : > { %v657_v19 = vpop.f32.mrf.mxu1 }
 0x2cc   : > { %v663_v51 = vadd.f32 %v657_v19, %v598_v45 }
 0x2cf   : > { %v703_v21 = vpop.f32.mrf.mxu2 }
 0x2d0   : > { %v717_v22 = vpop.f32.mrf.mxu3  ;;  %v722_v20 = vadd.f32 %v703_v21, %v660_v34 }
 0x2d1   : > { %v748_v8 = vpop.f32.mrf.mxu0  ;;  %v723_v29 = vadd.f32 %v717_v22, %v661_v38 }
 0x2d2   : > { %v767_v39 = vadd.f32 %v748_v8, %v722_v20 }
 0x2d3   : > { %v762_v9 = vpop.f32.mrf.mxu1 }
 0x2d4   : > { %v768_v46 = vadd.f32 %v762_v9, %v723_v29 }
 0x2d7   : > { %v705_v23 = vpop.f32.mrf.mxu2 }
 0x2d8   : > { %v719_v24 = vpop.f32.mrf.mxu3  ;;  %v724_v55 = vadd.f32 %v705_v23, %v662_v48 }
 0x2d9   : > { %v750_v25 = vpop.f32.mrf.mxu0  ;;  %v725_v56 = vadd.f32 %v719_v24, %v663_v51 }
 0x2da   : > { %v769_v60 = vadd.f32 %v750_v25, %v724_v55 }
 0x2db   : > { %v764_v26 = vpop.f32.mrf.mxu1 }
 0x2dc   : > { %v770_v63 = vadd.f32 %v764_v26, %v725_v56 }
 0x2df   : > { %v810_v27 = vpop.f32.mrf.mxu2 }
 0x2e0   : > { %v824_v16 = vpop.f32.mrf.mxu3  ;;  %v829_v49 = vadd.f32 %v810_v27, %v767_v39 }
 0x2e1   : > { %v874_v32 = vpop.f32.mrf.mxu0  ;;  %v830_v54 = vadd.f32 %v824_v16, %v768_v46  ;;  %v358_v46 = vld [vmem:[%s2370_s12 + $0x20] sm:$0xff] }
 0x2e2   : > { %v893_v57 = vadd.f32 %v874_v32, %v829_v49 }
 0x2e3   : > { %v888_v36 = vpop.f32.mrf.mxu1 }
 0x2e4   : > { %v894_v58 = vadd.f32 %v888_v36, %v830_v54 }
 0x2e7   : > { %v812_v28 = vpop.f32.mrf.mxu2 }
 0x2e8   : > { %v826_v41 = vpop.f32.mrf.mxu3  ;;  %v831_v4 = vadd.f32 %v812_v28, %v769_v60 }
 0x2e9   : > { %v876_v47 = vpop.f32.mrf.mxu0  ;;  %v832_v7 = vadd.f32 %v826_v41, %v770_v63 }
 0x2ea   : > { %v895_v18 = vadd.f32 %v876_v47, %v831_v4 }
 0x2eb   : > { %v890_v50 = vpop.f32.mrf.mxu1 }
 0x2ec   : > { %v896_v19 = vadd.f32 %v890_v50, %v832_v7 }
 0x2ef   : > { %v936_v59 = vpop.f32.mrf.mxu2 }
 0x2f0   : > { %v955_v61 = vadd.f32 %v936_v59, %v893_v57  ;;  %v950_v62 = vpop.f32.mrf.mxu3 }
 0x2f1   : > { %v956_v0 = vadd.f32 %v950_v62, %v894_v58  ;;  %v1000_v3 = vpop.f32.mrf.mxu0 }
 0x2f2   : > { %v1019_v2 = vadd.f32 %v1000_v3, %v955_v61 }
 0x2f3   : > { %v1014_v6 = vpop.f32.mrf.mxu1 }
 0x2f4   : > { %v1020_v12 = vadd.f32 %v1014_v6, %v956_v0 }
 0x2f6   : > { %v1023_v17 = vadd.f32 %v1020_v12, %v1019_v2 }
 0x2f7   : > { %v938_v21 = vpop.f32.mrf.mxu2 }
 0x2f8   : > { %1024 = vadd.xlane.f32.xlu2 %v1023_v17  ;;  %v957_v22 = vadd.f32 %v938_v21, %v895_v18  ;;  %v952_v8 = vpop.f32.mrf.mxu3 }
 0x2f9   : > { %v958_v9 = vadd.f32 %v952_v8, %v896_v19  ;;  %v1002_v23 = vpop.f32.mrf.mxu0 }
 0x2fa   : > { %v1021_v24 = vadd.f32 %v1002_v23, %v957_v22 }
 0x2fb   : > { %v1016_v25 = vpop.f32.mrf.mxu1 }
 0x2fc   : > { %v1022_v27 = vadd.f32 %v1016_v25, %v958_v9 }
 0x2fe   : > { %v1026_v26 = vadd.f32 %v1022_v27, %v1021_v24 }
 0x300   : > { %1027 = vadd.xlane.f32.xlu1 %v1026_v26 }
 0x36b   : > { %v1025_v15 = vpop.xlane.xlu2 %1024 }
 0x36c   : > { %v1029_v16 = vmul.f32 0.00390625, %v1025_v15  ;;  %v360_v15 = vld [vmem:[%s2370_s12 + $0x30] sm:$0xff] }
 0x36e   : > { %v2652_v31 = vsub.f32 %v1019_v2, %v1029_v16  ;;  %v2654_v32 = vsub.f32 %v1020_v12, %v1029_v16 }
 0x370   : > { %v1035_v34 = vmul.f32 %v2652_v31, %v2652_v31  ;;  %v1036_v36 = vmul.f32 %v2654_v32, %v2654_v32 }
 0x372   : > { %v1039_v38 = vadd.f32 %v1036_v36, %v1035_v34 }
 0x373   : > { %v1028_v20 = vpop.xlane.xlu1 %1027 }
 0x374   : > { %v1030_v29 = vmul.f32 0.00390625, %v1028_v20  ;;  %1040 = vadd.xlane.f32.xlu0 %v1039_v38 }
 0x376   : > { %v2660_v28 = vsub.f32 %v1021_v24, %v1030_v29  ;;  %v2662_v30 = vsub.f32 %v1022_v27, %v1030_v29 }
 0x378   : > { %v1037_v39 = vmul.f32 %v2660_v28, %v2660_v28  ;;  %v1038_v41 = vmul.f32 %v2662_v30, %v2662_v30 }
 0x37a   : > { %v1042_v45 = vadd.f32 %v1038_v41, %v1037_v39 }
 0x37c   : > { %1043 = vadd.xlane.f32.xlu2 %v1042_v45 }
 0x388   : > { %1119 = vperm.xlu0 %2032, %v358_v46  }
 0x3e7   : > { %v1041_v47 = vpop.xlane.xlu0 %1040 }
 0x3e8   : > { %v1045_v48 = vmul.f32 0.003921569, %v1041_v47  ;;  %v361_v47 = vld [vmem:[%s2370_s12 + $0x38] sm:$0xff] }
 0x3ea   : > { %2042 = vrsqrt.f32 %v1045_v48  ;;  %vm1054_vm13 = vcmp.eq.f32.partialorder %v1045_v48, inf  ;;  %v1057_v63 = vand.u32 2147483648, %v1045_v48  ;;  %vm1056_vm14 = vcmp.eq.f32.partialorder %v1045_v48, 0.0 }
 0x3ef   : > { %v1044_v49 = vpop.xlane.xlu2 %1043 }
 0x3f0   : > { %v2043_v50 = vpop.eup %2042  ;;  %v1046_v51 = vmul.f32 0.003921569, %v1044_v49 }
 0x3f1   : > { %v1048_v54 = vmul.f32 %v2043_v50, %v1045_v48 }
 0x3f2   : > { %2044 = vrsqrt.f32 %v1046_v51  ;;  %vm1066_vm15 = vcmp.eq.f32.partialorder %v1046_v51, inf  ;;  %v1069_v17 = vand.u32 2147483648, %v1046_v51  ;;  %vm1068_vm0 = vcmp.eq.f32.partialorder %v1046_v51, 0.0 }
 0x3f3   : > { %v1049_v55 = vmul.f32 %v2043_v50, %v1048_v54 }
 0x3f5   : > { %v1050_v56 = vmul.f32 0.5, %v1049_v55 }
 0x3f7   : > { %v1051_v57 = vsub.f32 1.5, %v1050_v56 }
 0x3f8   : > { %v2045_v58 = vpop.eup %2044 }
 0x3f9   : > { %v1052_v59 = vmul.f32 %v2043_v50, %v1051_v57  ;;  %v1060_v60 = vmul.f32 %v2045_v58, %v1046_v51  ;;  %v359_v50 = vld [vmem:[%s2370_s12 + $0x28] sm:$0xff] }
 0x3fb   : > { %v1053_v61 = vmul.f32 %v1052_v59, %v1045_v48  ;;  %v1061_v62 = vmul.f32 %v2045_v58, %v1060_v60 }
 0x3fd   : > { %v1062_v0 = vmul.f32 0.5, %v1061_v62  ;;  %v1055_v3 = vsel %vm1054_vm13, %v1045_v48, %v1053_v61 }
 0x3fe   : > { %v1058_v4 = vsel %vm1056_vm14, %v1057_v63, %v1055_v3 }
 0x3ff   : > { %v1063_v2 = vsub.f32 1.5, %v1062_v0  ;;  %v1071_v6 = vadd.f32 1e-05, %v1058_v4 }
 0x401   : > { %v1064_v7 = vmul.f32 %v2045_v58, %v1063_v2  ;;  %2046 = vrcp.f32 %v1071_v6  ;;  %v1084_v23 = vand.u32 2147483648, %v1071_v6  ;;  %v1082_v25 = vand.u32 2147483647, %v1071_v6  ;;  %v1120_v58 = vpop.permute.xlu0 %1119 }
 0x402   : > { %vm1078_vm5 = vweird.f32 %v1071_v6 }
 0x403   : > { %v1065_v12 = vmul.f32 %v1064_v7, %v1046_v51  ;;  %v1085_v16 = vor.u32 1.1754944e-38, %v1084_v23  ;;  %vm1083_vm13 = vcmp.eq.f32.partialorder %v1082_v25, 8.507059e+37 }
 0x405   : > { %v1067_v18 = vsel %vm1066_vm15, %v1046_v51, %v1065_v12 }
 0x406   : > { %v1070_v19 = vsel %vm1068_vm0, %v1069_v17, %v1067_v18 }
 0x407   : > { %v2047_v21 = vpop.eup %2046  ;;  %v1072_v22 = vadd.f32 1e-05, %v1070_v19 }
 0x408   : > { %v1074_v8 = vmul.f32 %v2047_v21, %v1071_v6  ;;  %vm1079_vm2 = vweird.f32 %v2047_v21 }
 0x409   : > { %2048 = vrcp.f32 %v1072_v22  ;;  %vm1080_vm9 = vmor %vm1078_vm5, %vm1079_vm2  ;;  %v1099_v39 = vand.u32 2147483648, %v1072_v22  ;;  %v1097_v45 = vand.u32 2147483647, %v1072_v22  ;;  %vm1093_vm15 = vweird.f32 %v1072_v22 }
 0x40a   : > { %v1075_v9 = vsub.f32 1.0, %v1074_v8 }
 0x40b   : > { %v1100_v48 = vor.u32 1.1754944e-38, %v1099_v39  ;;  %vm1098_vm2 = vcmp.eq.f32.partialorder %v1097_v45, 8.507059e+37 }
 0x40c   : > { %v1076_v24 = vmul.f32 %v2047_v21, %v1075_v9 }
 0x40e   : > { %v1077_v27 = vadd.f32 %v2047_v21, %v1076_v24 }
 0x40f   : > { %v2049_v26 = vpop.eup %2048 }
 0x410   : > { %v1081_v34 = vsel %vm1080_vm9, %v2047_v21, %v1077_v27  ;;  %v1089_v36 = vmul.f32 %v2049_v26, %v1072_v22  ;;  %vm1094_vm14 = vweird.f32 %v2049_v26 }
 0x411   : > { %v1086_v38 = vsel %vm1083_vm13, %v1085_v16, %v1081_v34  ;;  %vm1095_vm0 = vmor %vm1093_vm15, %vm1094_vm14 }
 0x412   : > { %v1087_v20 = vmul.f32 %v1086_v38, %v360_v15  ;;  %v1090_v29 = vsub.f32 1.0, %v1089_v36 }
 0x414   : > { %1105 = vperm.xlu1 %2033, %v1087_v20   ;;  %v1091_v41 = vmul.f32 %v2049_v26, %v1090_v29 }
 0x416   : > { %v1092_v46 = vadd.f32 %v2049_v26, %v1091_v41 }
 0x418   : > { %v1096_v49 = vsel %vm1095_vm0, %v2049_v26, %v1092_v46 }
 0x419   : > { %v1101_v51 = vsel %vm1098_vm2, %v1100_v48, %v1096_v49 }
 0x41a   : > { %v1102_v54 = vmul.f32 %v1101_v51, %v361_v47 }
 0x41c   : > { %1124 = vperm.xlu1 %2033, %v359_v50   ;;  %1110 = vperm.xlu2 %2031, %v1102_v54   ;;  %v1950_v54 = vld [vmem:[#allocation5 + $0x8] sm:$0xff] }
 0x476   : > { %v1111_v61 = vpop.permute.xlu2 %1110 }
 0x477   : > { %v1115_v0 = vmul.f32 %v1111_v61, %v2660_v28  ;;  %v1116_v6 = vmul.f32 %v1111_v61, %v2662_v30 }
 0x486   : > { %v1106_v55 = vpop.permute.xlu1 %1105 }
 0x487   : > { %v1113_v56 = vmul.f32 %v1106_v55, %v2652_v31  ;;  %v1114_v57 = vmul.f32 %v1106_v55, %v2654_v32 }
 0x489   : > { %v1127_v59 = vadd.f32 %v1120_v58, %v1113_v56  ;;  %v1128_v60 = vadd.f32 %v1120_v58, %v1114_v57  ;;  %v1949_v56 = vld [vmem:[#allocation5] sm:$0xff] }
 0x48b   : > { %vm1131_vm5 = vcmp.ge.f32.partialorder %v1127_v59, 0.0  ;;  %vm1132_vm9 = vcmp.ge.f32.partialorder %v1128_v60, 0.0  ;;  %v1135_v62 = vmul.f32 0.01, %v1127_v59  ;;  %v1136_v63 = vmul.f32 0.01, %v1128_v60 }
 0x48d   : > { %v2675_v3 = vsel %vm1131_vm5, %v1127_v59, %v1135_v62  ;;  %v2677_v4 = vsel %vm1132_vm9, %v1128_v60, %v1136_v63 }
 0x48e   : > { %1167 = vrot.lane.b32.xlu1 %v2677_v4, %s2193_s26  ;;  %1143 = vrot.lane.b32.xlu2 %v2675_v3, %s2192_s13  ;;  %v1125_v31 = vpop.permute.xlu1 %1124 }
 0x48f   : > { %1163 = vrot.lane.b32.xlu0 %v2675_v3, %s2193_s26  ;;  %v1129_v32 = vadd.f32 %v1125_v31, %v1115_v0  ;;  %v1130_v28 = vadd.f32 %v1125_v31, %v1116_v6 }
 0x491   : > { %v1137_v2 = vmul.f32 0.01, %v1129_v32  ;;  %vm1133_vm13 = vcmp.ge.f32.partialorder %v1129_v32, 0.0  ;;  %v1138_v12 = vmul.f32 0.01, %v1130_v28  ;;  %vm1134_vm14 = vcmp.ge.f32.partialorder %v1130_v28, 0.0 }
 0x493   : > { %v2686_v7 = vsel %vm1133_vm13, %v1129_v32, %v1137_v2  ;;  %v2694_v17 = vsel %vm1134_vm14, %v1130_v28, %v1138_v12 }
 0x494   : > { %v1369_v28 = vpack.c.bf16 %v2686_v7, %v2675_v3  ;;  %v1370_v12 = vpack.c.bf16 %v2694_v17, %v2677_v4 }
 0x496   : > { %1252 = vrot.lane.b32.xlu1 %v2675_v3, %s2194_s29  ;;  %1165 = vrot.lane.b32.xlu2 %v2686_v7, %s2193_s26 }
 0x497   : > { %1147 = vrot.lane.b32.xlu0 %v2677_v4, %s2192_s13 }
 0x49e   : > { %1145 = vrot.lane.b32.xlu1 %v2686_v7, %s2192_s13  ;;  %1149 = vrot.lane.b32.xlu2 %v2694_v17, %s2192_s13  ;;  %s1959_s13 = sshll.u32 %s2257_s25, 4  ;;  %s1678_s25 = scalar_lea.sflag [#allocation4], %s2331_s19 }
 0x49f   : > { %1169 = vrot.lane.b32.xlu0 %v2694_v17, %s2193_s26  ;;  %s1796_s26 = sshll.u32 %s2331_s19, 4 }
 0x4a6   : > { %1258 = vrot.lane.b32.xlu1 %v2694_v17, %s2194_s29  ;;  %1256 = vrot.lane.b32.xlu2 %v2677_v4, %s2194_s29 }
 0x4a7   : > { %1309 = vrot.lane.b32.xlu0 %v2675_v3, %s2195_s30 }
 0x4ae   : > { %1313 = vrot.lane.b32.xlu1 %v2677_v4, %s2195_s30  ;;  %1311 = vrot.lane.b32.xlu2 %v2686_v7, %s2195_s30 }
 0x4af   : > { %1254 = vrot.lane.b32.xlu0 %v2686_v7, %s2194_s29 }
 0x4b6   : > { %1464 = vrot.lane.b32.xlu1 %v2675_v3, %s2197_s9  ;;  %1407 = vrot.lane.b32.xlu2 %v2675_v3, %s2196_s18 }
 0x4b7   : > { %1315 = vrot.lane.b32.xlu0 %v2694_v17, %s2195_s30 }
 0x4be   : > { %1409 = vrot.lane.b32.xlu1 %v2686_v7, %s2196_s18  ;;  %1413 = vrot.lane.b32.xlu2 %v2694_v17, %s2196_s18 }
 0x4bf   : > { %1411 = vrot.lane.b32.xlu0 %v2677_v4, %s2196_s18  ;;  %s1689_s18 = scalar_lea.hbm %s2911_s6, %s1959_s13 }
 0x4c6   : > { %1470 = vrot.lane.b32.xlu1 %v2694_v17, %s2197_s9  ;;  %1468 = vrot.lane.b32.xlu2 %v2677_v4, %s2197_s9 }
 0x4c7   : > { %1521 = vrot.lane.b32.xlu0 %v2675_v3, %s2198_s20 }
 0x4ce   : > { %1525 = vrot.lane.b32.xlu1 %v2677_v4, %s2198_s20  ;;  %1523 = vrot.lane.b32.xlu2 %v2686_v7, %s2198_s20 }
 0x4cf   : > { %1466 = vrot.lane.b32.xlu0 %v2686_v7, %s2197_s9  ;;  %s303_s9 = scalar_lea.vmem [#allocation7], %s1796_s26 }
 0x4d6   : > { %1580 = vrot.lane.b32.xlu1 %v2686_v7, %s2199_s14  ;;  %1578 = vrot.lane.b32.xlu2 %v2675_v3, %s2199_s14 }
 0x4d7   : > { %1527 = vrot.lane.b32.xlu0 %v2694_v17, %s2198_s20  ;;  %s1691_s20 = sshll.u32 %s303_s9, 4  ;;  %s1692_s20 = int_to_ptr.vmem [resolvable:$true] %s1691_s20 }
 0x4de   : > { %1584 = vrot.lane.b32.xlu2 %v2694_v17, %s2199_s14 }
 0x4df   : > { %1582 = vrot.lane.b32.xlu0 %v2677_v4, %s2199_s14  ;;  %s1693_s14 = sshll.u32 %s1689_s18, 4  ;;  %s1694_s14 = int_to_ptr.hbm [resolvable:$true] %s1693_s14 }
 0x4e0   : > { %s2128_s27 = sshra.s32 %s1694_s14, 4  ;;  %s2129_s27 = int_to_ptr.hbm [resolvable:$true] %s2128_s27 }
 0x4e1   : > { %s2130_s8 = scalar_lea.hbm %s2129_s27, 16  ;;  %p2135_p9 = scmp.lt.s32.totalorder %s2129_s27, %s2911_s6 }
 0x4e2   : > { %p2131_p4 = scmp.ne.s32.totalorder %s2129_s27, %s2130_s8 }
 0x4e4   : > { %p2132_p8 = pnand %p2131_p4, %p2303_p7 }
 0x4e6   : > { %p2133_p11 = pneg %p2132_p8 }
 0x4e8   : > { %v1144_v30 = vpop.permute.xlu2 %1143 }
 0x4f0   : > { %v1166_v18 = vpop.permute.xlu2 %1165 }
 0x4f8   : > { %v1150_v19 = vpop.permute.xlu2 %1149 }
 0x500   : > { %v1168_v21 = vpop.permute.xlu1 %1167  ;;  %v1257_v9 = vpop.permute.xlu2 %1256 }
 0x501   : > { %v1164_v22 = vpop.permute.xlu0 %1163 }
 0x502   : > { %v1171_v27 = vsel %vm513_vm1, %v1164_v22, %v1168_v21  ;;  %v1173_v26 = vsel %vm513_vm1, %v1168_v21, %v1164_v22 }
 0x503   : > { %v1175_v46 = vmul.f32 %v2465_v40, %v1173_v26 }
 0x508   : > { %v1253_v8 = vpop.permute.xlu1 %1252  ;;  %v1312_v47 = vpop.permute.xlu2 %1311 }
 0x509   : > { %v1148_v23 = vpop.permute.xlu0 %1147  ;;  %v1262_v58 = vsel %vm608_vm6, %v1257_v9, %v1253_v8 }
 0x50a   : > { %v1151_v24 = vsel %vm490_vm4, %v1144_v30, %v1148_v23  ;;  %v1153_v25 = vsel %vm490_vm4, %v1148_v23, %v1144_v30  ;;  %v1264_v63 = vmul.f32 %v1262_v58, %v2515_v13  ;;  %v1951_v30 = vld [vmem:[#allocation5 + $0x10] sm:$0xff] }
 0x50b   : > { %v1155_v16 = vmul.f32 %v1153_v25, %v2483_v52  ;;  %v1156_v34 = vmul.f32 %v1151_v24, %v2486_v53  ;;  %v1952_v24 = vld [vmem:[#allocation5 + $0x18] sm:$0xff] }
 0x510   : > { %v1146_v15 = vpop.permute.xlu1 %1145 }
 0x511   : > { %v1170_v36 = vpop.permute.xlu0 %1169  ;;  %v1152_v38 = vsel %vm490_vm4, %v1146_v15, %v1150_v19  ;;  %v1154_v20 = vsel %vm490_vm4, %v1150_v19, %v1146_v15 }
 0x512   : > { %v1172_v29 = vsel %vm513_vm1, %v1166_v18, %v1170_v36  ;;  %v1174_v39 = vsel %vm513_vm1, %v1170_v36, %v1166_v18  ;;  %v1157_v41 = vmul.f32 %v1154_v20, %v2483_v52  ;;  %v1158_v45 = vmul.f32 %v1152_v38, %v2486_v53 }
 0x513   : > { %v1177_v48 = vmul.f32 %v2465_v40, %v1174_v39  ;;  %v1183_v49 = vpack.c.bf16 %v1172_v29, %v1171_v27  ;;  %v1408_v40 = vpop.permute.xlu2 %1407  ;;  %v1260_v53 = vsel %vm608_vm6, %v1253_v8, %v1257_v9 }
 0x514   : > { %v1161_v50 = vpack.c.bf16 %v1157_v41, %v1155_v16  ;;  %v1162_v51 = vpack.c.bf16 %v1158_v45, %v1156_v34  ;;  %v1265_v0 = vmul.f32 %v1260_v53, %v2518_v14  ;;  %v1953_v41 = vld [vmem:[#allocation5 + $0x20] sm:$0xff] }
 0x515   : > { %v1182_v55 = vpack.c.bf16 %v1177_v48, %v1175_v46  ;;  %1212 = vmatpush.bf16.msra.mxu3 %v1183_v49  ;;  %v1954_v48 = vld [vmem:[#allocation5 + $0x28] sm:$0xff] }
 0x516   : > { %1233 = vmatpush.bf16.msrb.mxu0 %v1161_v50  ;;  %1246 = vmatpush.bf16.msrb.mxu1 %v1162_v51 }
 0x517   : > { %1199 = vmatpush.bf16.msra.mxu2 %v1182_v55 }
 0x518   : > { %v1259_v57 = vpop.permute.xlu1 %1258  ;;  %1878 = vmatmul.msk.bf16.vlgmr.msra.gmra.mxu3 %vm532_vm3, %v1950_v54 }
 0x519   : > { %v1310_v52 = vpop.permute.xlu0 %1309  ;;  %1883 = vmatmul.msk.bf16.vlgmr.msrb.gmra.mxu0 %vm532_vm3, %v1949_v56  ;;  %1884 = vmatmul.msk.bf16.vlgmr.msrb.gmra.mxu1 %vm532_vm3, %v1949_v56 }
 0x51a   : > { %1877 = vmatmul.msk.bf16.vlgmr.msra.gmra.mxu2 %vm532_vm3, %v1950_v54 }
 0x51b   : > { %v1414_v18 = vpop.permute.xlu2 %1413 }
 0x520   : > { %v1314_v59 = vpop.permute.xlu1 %1313 }
 0x521   : > { %v1255_v60 = vpop.permute.xlu0 %1254  ;;  %v1317_v19 = vsel %vm672_vm7, %v1310_v52, %v1314_v59 }
 0x522   : > { %v1261_v61 = vsel %vm608_vm6, %v1255_v60, %v1259_v57  ;;  %v1263_v62 = vsel %vm608_vm6, %v1259_v57, %v1255_v60  ;;  %v1322_v17 = vmul.f32 %v1317_v19, %v2467_v42 }
 0x523   : > { %v1266_v31 = vmul.f32 %v1263_v62, %v2515_v13  ;;  %v1267_v32 = vmul.f32 %v1261_v61, %v2518_v14  ;;  %v1319_v13 = vsel %vm672_vm7, %v1314_v59, %v1310_v52  ;;  %v1469_v27 = vpop.permute.xlu2 %1468  ;;  %v1955_v59 = vld [vmem:[#allocation5 + $0x30] sm:$0xff]  ;;  %v2050_v62 = vld [vmem:[%s2335_s15] sm:$0xff] }
 0x524   : > { %v1321_v7 = vmul.f32 %v1319_v13, %v2460_v37  ;;  %v1956_v13 = vld [vmem:[#allocation5 + $0x38] sm:$0xff] }
 0x525   : > { %v1271_v2 = vpack.c.bf16 %v1266_v31, %v1264_v63  ;;  %v1272_v6 = vpack.c.bf16 %v1267_v32, %v1265_v0  ;;  %v2051_v63 = vld [vmem:[%s2335_s15 + $0x10] sm:$0xff] }
 0x527   : > { %1288 = vmatpush.bf16.msrb.mxu2 %v1271_v2  ;;  %1301 = vmatpush.bf16.msrb.mxu3 %v1272_v6 }
 0x528   : > { %v1465_v14 = vpop.permute.xlu1 %1464 }
 0x529   : > { %v1316_v21 = vpop.permute.xlu0 %1315 }
 0x52a   : > { %v1318_v3 = vsel %vm672_vm7, %v1312_v47, %v1316_v21  ;;  %v1320_v4 = vsel %vm672_vm7, %v1316_v21, %v1312_v47  ;;  %1889 = vmatmul.msk.bf16.vlgmr.msrb.gmra.mxu2 %vm532_vm3, %v1951_v30  ;;  %1890 = vmatmul.msk.bf16.vlgmr.msrb.gmra.mxu3 %vm532_vm3, %v1951_v30 }
 0x52b   : > { %1386 = vmatpush.bf16.msra.mxu2 %v1369_v28  ;;  %1399 = vmatpush.bf16.msra.mxu3 %v1370_v12  ;;  %v1323_v22 = vmul.f32 %v1320_v4, %v2460_v37  ;;  %v1324_v8 = vmul.f32 %v1318_v3, %v2467_v42  ;;  %v1524_v47 = vpop.permute.xlu2 %1523  ;;  %v2052_v28 = vld [vmem:[%s2335_s15 + $0x8] sm:$0xff]  ;;  %v2053_v12 = vld [vmem:[%s2335_s15 + $0x18] sm:$0xff]  ;;  %s2134_s15 = scalar_lea.hbm %s2911_s6, 32 }
 0x52c   : > { %v1638_v30 = vpack.c.bf16 %v2053_v12, %v2052_v28  ;;  %p2136_p2 = scmp.lt.s32.totalorder %s2134_s15, %s2130_s8 }
 0x52d   : > { %v1328_v9 = vpack.c.bf16 %v1323_v22, %v1321_v7  ;;  %v1329_v23 = vpack.c.bf16 %v1324_v8, %v1322_v17 }
 0x52e   : > { %p2137_p10 = por %p2136_p2, %p2135_p9 }
 0x52f   : > { %1345 = vmatpush.bf16.msra.mxu0 %v1328_v9  ;;  %1358 = vmatpush.bf16.msra.mxu1 %v1329_v23 }
 0x530   : > { %v1410_v25 = vpop.permute.xlu1 %1409  ;;  %p2138_p12 = pnand %p2137_p10, %p2133_p11 }
 0x531   : > { %v1412_v26 = vpop.permute.xlu0 %1411  ;;  %v1416_v15 = vsel %vm779_vm8, %v1410_v25, %v1414_v18  ;;  %v1418_v16 = vsel %vm779_vm8, %v1414_v18, %v1410_v25  ;;  %v1957_v25 = vld [vmem:[#allocation5 + $0x40] sm:$0xff] }
 0x532   : > { %v1415_v37 = vsel %vm779_vm8, %v1408_v40, %v1412_v26  ;;  %v1417_v42 = vsel %vm779_vm8, %v1412_v26, %v1408_v40  ;;  %v1421_v34 = vmul.f32 %v1416_v15, %v2506_v5  ;;  %v1422_v36 = vmul.f32 %v1418_v16, %v2510_v11  ;;  %1895 = vmatmul.msk.bf16.vlgmr.msra.gmra.mxu0 %vm532_vm3, %v1952_v24 }
 0x533   : > { %v1419_v38 = vmul.f32 %v1415_v37, %v2506_v5  ;;  %v1420_v20 = vmul.f32 %v1417_v42, %v2510_v11  ;;  %1896 = vmatmul.msk.bf16.vlgmr.msra.gmra.mxu1 %vm532_vm3, %v1952_v24  ;;  %v1472_v5 = vsel %vm841_vm10, %v1465_v14, %v1469_v27  ;;  %v1474_v11 = vsel %vm841_vm10, %v1469_v27, %v1465_v14  ;;  %v1579_v40 = vpop.permute.xlu2 %1578 }
 0x534   : > { %v1476_v54 = vmul.f32 %v1472_v5, %v2588_v10  ;;  %v1477_v55 = vmul.f32 %v1474_v11, %v2590_v35 }
 0x535   : > { %v1426_v29 = vpack.c.bf16 %v1421_v34, %v1419_v38  ;;  %v1427_v39 = vpack.c.bf16 %v1422_v36, %v1420_v20 }
 0x537   : > { %1443 = vmatpush.bf16.msrb.mxu0 %v1426_v29  ;;  %1456 = vmatpush.bf16.msrb.mxu1 %v1427_v39 }
 0x538   : > { %v1471_v46 = vpop.permute.xlu1 %1470 }
 0x539   : > { %v1522_v45 = vpop.permute.xlu0 %1521 }
 0x53a   : > { %1901 = vmatmul.msk.bf16.vlgmr.msra.gmra.mxu2 %vm532_vm3, %v1953_v41  ;;  %1902 = vmatmul.msk.bf16.vlgmr.msra.gmra.mxu3 %vm532_vm3, %v1953_v41 }
 0x53b   : > { %v1585_v14 = vpop.permute.xlu2 %1584 }
 0x540   : > { %v1526_v52 = vpop.permute.xlu1 %1525 }
 0x541   : > { %v1467_v49 = vpop.permute.xlu0 %1466  ;;  %v1531_v60 = vsel %vm905_vm11, %v1526_v52, %v1522_v45 }
 0x542   : > { %v1473_v50 = vsel %vm841_vm10, %v1467_v49, %v1471_v46  ;;  %v1475_v51 = vsel %vm841_vm10, %v1471_v46, %v1467_v49  ;;  %1907 = vmatmul.msk.bf16.vlgmr.msrb.gmra.mxu0 %vm532_vm3, %v1954_v48  ;;  %v1534_v32 = vmul.f32 %v2577_v1, %v1531_v60 }
 0x543   : > { %v1478_v56 = vmul.f32 %v1473_v50, %v2588_v10  ;;  %v1479_v57 = vmul.f32 %v1475_v51, %v2590_v35  ;;  %1908 = vmatmul.msk.bf16.vlgmr.msrb.gmra.mxu1 %vm532_vm3, %v1954_v48  ;;  %v1637_v10 = vpack.c.bf16 %v2051_v63, %v2050_v62  ;;  %v1529_v35 = vsel %vm905_vm11, %v1522_v45, %v1526_v52 }
 0x545   : > { %v1483_v53 = vpack.c.bf16 %v1478_v56, %v1476_v54  ;;  %v1484_v58 = vpack.c.bf16 %v1479_v57, %v1477_v55 }
 0x547   : > { %1500 = vmatpush.bf16.msrb.mxu2 %v1483_v53  ;;  %1513 = vmatpush.bf16.msrb.mxu3 %v1484_v58 }
 0x548   : > { %v1581_v19 = vpop.permute.xlu1 %1580 }
 0x549   : > { %v1528_v61 = vpop.permute.xlu0 %1527  ;;  %v1587_v21 = vsel %vm967_vm12, %v1581_v19, %v1585_v14  ;;  %v1589_v3 = vsel %vm967_vm12, %v1585_v14, %v1581_v19 }
 0x54a   : > { %v1530_v0 = vsel %vm905_vm11, %v1524_v47, %v1528_v61  ;;  %v1532_v31 = vsel %vm905_vm11, %v1528_v61, %v1524_v47  ;;  %1913 = vmatmul.msk.bf16.vlgmr.msrb.gmra.mxu2 %vm532_vm3, %v1955_v59  ;;  %1914 = vmatmul.msk.bf16.vlgmr.msrb.gmra.mxu3 %vm532_vm3, %v1955_v59  ;;  %v1592_v17 = vmul.f32 %v1587_v21, %v2626_v43 }
 0x54b   : > { %v1536_v2 = vmul.f32 %v2577_v1, %v1532_v31  ;;  %v1540_v6 = vpack.c.bf16 %v1530_v0, %v1529_v35  ;;  %v1593_v22 = vmul.f32 %v1589_v3, %v2628_v44 }
 0x54d   : > { %v1541_v18 = vpack.c.bf16 %v1536_v2, %v1534_v32  ;;  %1557 = vmatpush.bf16.msra.mxu0 %v1540_v6 }
 0x54f   : > { %1570 = vmatpush.bf16.msra.mxu1 %v1541_v18 }
 0x551   : > { %1654 = vmatpush.bf16.msrb.mxu0 %v1637_v10  ;;  %v1583_v1 = vpop.permute.xlu0 %1582 }
 0x552   : > { %v1586_v4 = vsel %vm967_vm12, %v1579_v40, %v1583_v1  ;;  %v1588_v7 = vsel %vm967_vm12, %v1583_v1, %v1579_v40  ;;  %1919 = vmatmul.msk.bf16.vlgmr.msra.gmra.mxu0 %vm532_vm3, %v1956_v13 }
 0x553   : > { %1667 = vmatpush.bf16.msrb.mxu1 %v1638_v30  ;;  %v1590_v8 = vmul.f32 %v1586_v4, %v2626_v43  ;;  %v1591_v9 = vmul.f32 %v1588_v7, %v2628_v44 }
 0x554   : > { %1920 = vmatmul.msk.bf16.vlgmr.msra.gmra.mxu1 %vm532_vm3, %v1956_v13 }
 0x555   : > { %v1597_v23 = vpack.c.bf16 %v1592_v17, %v1590_v8  ;;  %v1598_v24 = vpack.c.bf16 %v1593_v22, %v1591_v9 }
 0x557   : > { %1614 = vmatpush.bf16.msra.mxu2 %v1597_v23  ;;  %1627 = vmatpush.bf16.msra.mxu3 %v1598_v24 }
 0x55a   : > { %1925 = vmatmul.msk.bf16.vlgmr.msra.gmra.mxu2 %vm532_vm3, %v1957_v25  ;;  %1926 = vmatmul.msk.bf16.vlgmr.msra.gmra.mxu3 %vm532_vm3, %v1957_v25 }
 0x562   : > { %1931 = vmatmul.msk.bf16.vlgmr.msrb.gmra.mxu0 %vm532_vm3, %v1958_v33 }
 0x564   : > { %1932 = vmatmul.msk.bf16.vlgmr.msrb.gmra.mxu1 %vm532_vm3, %v1958_v33 }
 0x596   : > { %v1235_v43 = vpop.f32.mrf.mxu0  ;;  %v1248_v44 = vpop.f32.mrf.mxu1 }
 0x59b   : > { %v1214_v27 = vpop.f32.mrf.mxu3 }
 0x59c   : > { %v1249_v55 = vadd.f32 %v1248_v44, %v1214_v27 }
 0x59d   : > { %v1201_v26 = vpop.f32.mrf.mxu2 }
 0x59e   : > { %v1237_v15 = vpop.f32.mrf.mxu0  ;;  %v1250_v16 = vpop.f32.mrf.mxu1  ;;  %v1236_v54 = vadd.f32 %v1235_v43, %v1201_v26 }
 0x5a3   : > { %v1216_v37 = vpop.f32.mrf.mxu3 }
 0x5a5   : > { %v1203_v42 = vpop.f32.mrf.mxu2 }
 0x5ad   : > { %v1290_v34 = vpop.f32.mrf.mxu2  ;;  %v1303_v36 = vpop.f32.mrf.mxu3 }
 0x5ae   : > { %v1307_v56 = vadd.f32 %v1290_v34, %v1236_v54  ;;  %v1308_v57 = vadd.f32 %v1303_v36, %v1249_v55 }
 0x5af   : > { %v1347_v38 = vpop.f32.mrf.mxu0 }
 0x5b0   : > { %v1360_v20 = vpop.f32.mrf.mxu1  ;;  %v1364_v58 = vadd.f32 %v1347_v38, %v1307_v56 }
 0x5b1   : > { %v1365_v60 = vadd.f32 %v1360_v20, %v1308_v57 }
 0x5b5   : > { %v1292_v29 = vpop.f32.mrf.mxu2  ;;  %v1305_v39 = vpop.f32.mrf.mxu3 }
 0x5b7   : > { %v1349_v41 = vpop.f32.mrf.mxu0 }
 0x5b8   : > { %v1362_v45 = vpop.f32.mrf.mxu1 }
 0x5bd   : > { %v1388_v46 = vpop.f32.mrf.mxu2  ;;  %v1401_v47 = vpop.f32.mrf.mxu3 }
 0x5be   : > { %v1405_v61 = vadd.f32 %v1388_v46, %v1364_v58  ;;  %v1406_v62 = vadd.f32 %v1401_v47, %v1365_v60 }
 0x5bf   : > { %v1445_v48 = vpop.f32.mrf.mxu0 }
 0x5c0   : > { %v1458_v5 = vpop.f32.mrf.mxu1  ;;  %v1462_v10 = vadd.f32 %v1445_v48, %v1405_v61 }
 0x5c1   : > { %v1463_v0 = vadd.f32 %v1458_v5, %v1406_v62 }
 0x5c5   : > { %v1390_v11 = vpop.f32.mrf.mxu2  ;;  %v1403_v49 = vpop.f32.mrf.mxu3 }
 0x5c7   : > { %v1447_v50 = vpop.f32.mrf.mxu0 }
 0x5c8   : > { %v1460_v51 = vpop.f32.mrf.mxu1 }
 0x5cd   : > { %v1502_v52 = vpop.f32.mrf.mxu2  ;;  %v1515_v40 = vpop.f32.mrf.mxu3 }
 0x5ce   : > { %v1519_v32 = vadd.f32 %v1502_v52, %v1462_v10  ;;  %v1520_v6 = vadd.f32 %v1515_v40, %v1463_v0 }
 0x5cf   : > { %v1559_v53 = vpop.f32.mrf.mxu0 }
 0x5d0   : > { %v1576_v28 = vadd.f32 %v1559_v53, %v1519_v32 }
 0x5d1   : > { %v1572_v59 = vpop.f32.mrf.mxu1 }
 0x5d2   : > { %v1577_v12 = vadd.f32 %v1572_v59, %v1520_v6 }
 0x5d5   : > { %v1504_v63 = vpop.f32.mrf.mxu2  ;;  %v1517_v35 = vpop.f32.mrf.mxu3 }
 0x5d7   : > { %v1561_v31 = vpop.f32.mrf.mxu0 }
 0x5d9   : > { %v1574_v2 = vpop.f32.mrf.mxu1 }
 0x5dd   : > { %v1616_v30 = vpop.f32.mrf.mxu2  ;;  %v1629_v19 = vpop.f32.mrf.mxu3 }
 0x5de   : > { %v1633_v18 = vadd.f32 %v1616_v30, %v1576_v28  ;;  %v1634_v13 = vadd.f32 %v1629_v19, %v1577_v12 }
 0x5df   : > { %v1656_v14 = vpop.f32.mrf.mxu0 }
 0x5e0   : > { %v1673_v21 = vadd.f32 %v1656_v14, %v1633_v18 }
 0x5e1   : > { %v1669_v3 = vpop.f32.mrf.mxu1 }
 0x5e2   : > { %v1674_v1 = vadd.f32 %v1669_v3, %v1634_v13  ;;  %1675 = vst [vmem:[%s303_s9] sm:$0xff] %v1673_v21 }
 0x5e4   : > { %1676 = vst [vmem:[%s303_s9 + $0x8] sm:$0xff] %v1674_v1 }
 0x5e5   : > { %2141 = shalt.err (!%p2138_p12)
}
 0x5e6   : > { %1966 = dma.vmem_to_hbm [thread:$0]  (%p2303_p7), %s1692_s20, 256, %s1694_s14, %s1678_s25   ;;  %v1618_v4 = vpop.f32.mrf.mxu2  ;;  %v1631_v7 = vpop.f32.mrf.mxu3 }
 0x5e7   : > { %v1658_v17 = vpop.f32.mrf.mxu0 }
 0x5e9   : > { %v1671_v22 = vpop.f32.mrf.mxu1 }
 0x5ea PF: > { %s1705_s19 = sand.u32 1, %s2172_s21   ;;  %p2917_p13 = scmp.ge.s32.totalorder %s2184_s24, 2 }
 0x5eb   : > { %s1706_s26 = scalar_lea.sflag [#allocation4], %s1705_s19 }
 0x5ec   : > { %p1977_p0 = pnand %p2917_p13, %p2271_p6 }
 0x5ee   : > { %p1978_p3 = pneg %p1977_p0 }
 0x5f0   : > { %2167 = dma.done.wait (%p1978_p3), %s1706_s26, 256  }
 0x5f1   : > { %2169 = vsyncadd (%p1978_p3), %s1706_s26, 4294967040  ;;  %p20_p7 = scmp.ge.s32.totalorder %s2289_s11, 4   ;;  %s2918_s21 = smov %s2176_s22 }
 0x5f2   : > { %s2919_s22 = smov %s2180_s23  ;;  %s2920_s23 = smov %s2299_s16 }
 0x5f3   : > { %s2921_s24 = smov %s2289_s11  ;;  %22 = sbr.rel (!%p20_p7) target bundleno = 6 (0x6), region = 112 }
 0x5f8   :  { %1712 = vsyncpa [#allocation3], 1 }
 0x5f9   :  { %1714 = vsyncpa [#allocation3 + $0x1], 1 }
 0x5fa   :  { %1715 = vsyncpa [#allocation6], 1 }
 0x5fb   :  { %1716 = vsyncpa [#allocation4], 1 }
 0x5fc   :  { %1718 = vsyncpa [#allocation4 + $0x1], 1 }

</bundles_post_ra>
